<compile_context>
chip_gen: v6e
topology: v6e:2x2x1
jax: 0.10.0
libtpu: 0.0.40
codegen_flags: <defaults>
</compile_context>

<pallas_src>
import jax
import jax.numpy as jnp
import numpy as np
from jax.experimental import pallas as pl
from jax.experimental.pallas import tpu as pltpu


def _moe_kernel(active_ref, p_ref, x_ref, w1_ref, b1_ref, w2_ref, b2_ref,
                out_ref, *scratch):
    b = pl.program_id(0)          # token-tile index ("parallel")
    e = pl.program_id(1)          # expert index ("arbitrary" reduction)
    num_e = pl.num_programs(1)

    # f32 output: accumulate directly into the resident output block.
    # non-f32 output: accumulate into the f32 VMEM scratch.
    acc_ref = scratch[0] if scratch else out_ref

    @pl.when(e == 0)
    def _():
        acc_ref[...] = jnp.zeros_like(acc_ref)

    # Skip the expert MLP entirely if no token in this tile has nonzero
    # gate weight for expert e (flag computed in the wrapper, SMEM scalar).
    @pl.when(active_ref[b * num_e + e] != 0)
    def _():
        w1 = w1_ref[0]            # (D, H)   compute dtype (f32 or bf16)
        b1 = b1_ref[0]            # (1, H)
        w2 = w2_ref[0]            # (H, D)
        b2 = b2_ref[0]            # (1, D)

        h = jnp.dot(x_ref[...], w1, preferred_element_type=jnp.float32)
        h = jnp.maximum(h + b1.astype(jnp.float32), 0.0)          # (TB, H) f32
        y = jnp.dot(h.astype(w2.dtype), w2,
                    preferred_element_type=jnp.float32)
        y = y + b2.astype(jnp.float32)                            # (TB, D) f32

        p_e = p_ref[0].astype(jnp.float32)                        # (TB, 1)
        acc_ref[...] += (p_e * y).astype(acc_ref.dtype)

    if scratch:
        @pl.when(e == num_e - 1)
        def _():
            out_ref[...] = acc_ref[...].astype(out_ref.dtype)


def _gate_probs(x, wg, bg, *, threshold, num_experts):
    """softmax gate + threshold renormalization (PyTorch default branch), f32."""
    logits = (x.astype(jnp.float32) @ wg.astype(jnp.float32)
              + bg.astype(jnp.float32)[0])
    probs = jax.nn.softmax(logits, axis=-1)
    mask = (probs > threshold).astype(jnp.float32)
    sum_mask = mask.sum(axis=-1, keepdims=True)
    mask = jnp.where(sum_mask == 0.0,
                     jnp.full_like(mask, 1.0 / num_experts), mask)
    return mask / mask.sum(axis=-1, keepdims=True)


def dense_moe_forward(x, params, *, threshold=0.5, compute_dtype=None,
                      block_b=128):
    B, D = x.shape
    E = params["wg"].shape[1]
    H = params["w1"].shape[-1]
    out_dtype = x.dtype
    if compute_dtype is None:
        compute_dtype = x.dtype

    # --- gate hoisted out of the kernel (tiny; fuses in XLA) ---
    probs = _gate_probs(x, params["wg"], params["bg"],
                        threshold=threshold, num_experts=E)      # (B, E) f32

    TB = min(block_b, B)
    assert B % TB == 0, "batch must be a multiple of the token tile"
    nb = B // TB

    probs_t = jnp.transpose(probs)[:, :, None]                   # (E, B, 1)
    active = (probs.reshape(nb, TB, E) > 0.0).any(axis=1)
    active = active.astype(jnp.int32).reshape(nb * E)            # (nb*E,)

    # Stream expert weights / activations in compute_dtype (bf16 halves HBM).
    xc = x.astype(compute_dtype)
    w1 = params["w1"].astype(compute_dtype)
    b1 = params["b1"].astype(compute_dtype)
    w2 = params["w2"].astype(compute_dtype)
    b2 = params["b2"].astype(compute_dtype)

    use_acc_scratch = np.dtype(out_dtype) != np.dtype(np.float32)
    scratch_shapes = ([pltpu.VMEM((TB, D), jnp.float32)]
                      if use_acc_scratch else [])

    grid_spec = pltpu.PrefetchScalarGridSpec(
        num_scalar_prefetch=1,
        grid=(nb, E),
        in_specs=[
            pl.BlockSpec((1, TB, 1), lambda b, e, flags: (e, b, 0)),  # probs
            pl.BlockSpec((TB, D),    lambda b, e, flags: (b, 0)),     # x
            pl.BlockSpec((1, D, H),  lambda b, e, flags: (e, 0, 0)),  # w1
            pl.BlockSpec((1, 1, H),  lambda b, e, flags: (e, 0, 0)),  # b1
            pl.BlockSpec((1, H, D),  lambda b, e, flags: (e, 0, 0)),  # w2
            pl.BlockSpec((1, 1, D),  lambda b, e, flags: (e, 0, 0)),  # b2
        ],
        out_specs=pl.BlockSpec((TB, D), lambda b, e, flags: (b, 0)),
        scratch_shapes=scratch_shapes,
    )

    return pl.pallas_call(
        _moe_kernel,
        grid_spec=grid_spec,
        out_shape=jax.ShapeDtypeStruct((B, D), out_dtype),
        compiler_params=pltpu.CompilerParams(
            dimension_semantics=("parallel", "arbitrary")),
    )(active, probs_t, xc, w1, b1, w2, b2)


def dense_moe_reference(x, params, *, threshold=0.5, compute_dtype=None):
    """Pure-JAX reference matching the PyTorch forward (default args)."""
    if compute_dtype is None:
        compute_dtype = x.dtype
    E = params["wg"].shape[1]
    probs = _gate_probs(x, params["wg"], params["bg"],
                        threshold=threshold, num_experts=E)

    xc = x.astype(compute_dtype)
    outs = []
    for e in range(E):
        w1 = params["w1"][e].astype(compute_dtype)
        b1 = params["b1"][e, 0].astype(compute_dtype)
        w2 = params["w2"][e].astype(compute_dtype)
        b2 = params["b2"][e, 0].astype(compute_dtype)
        h = jnp.dot(xc, w1, preferred_element_type=jnp.float32)
        h = jnp.maximum(h + b1.astype(jnp.float32), 0.0)
        y = jnp.dot(h.astype(compute_dtype), w2,
                    preferred_element_type=jnp.float32)
        outs.append(y + b2.astype(jnp.float32))
    stack = jnp.stack(outs, axis=1)                 # (B, E, D) f32
    out = (probs[..., None] * stack).sum(axis=1)    # (B, D) f32
    return out.astype(x.dtype)


if __name__ == "__main__":
    B = 128          # tokens (MXU M dim; fills sublanes)
    D = 128          # d_model (lane-dense output, multiple of 128)
    E = 4            # experts
    H = 4 * D        # expert hidden = 512 (multiple of 128)

    key = jax.random.PRNGKey(0)
    kx, kg, kbg, k1, kb1, k2, kb2 = jax.random.split(key, 7)

    x = jax.random.normal(kx, (B, D), dtype=jnp.float32)
    params = {
        "wg": 0.3 * jax.random.normal(kg, (D, E), dtype=jnp.float32),
        "bg": 0.1 * jax.random.normal(kbg, (1, E), dtype=jnp.float32),
        "w1": 0.1 * jax.random.normal(k1, (E, D, H), dtype=jnp.float32),
        "b1": 0.1 * jax.random.normal(kb1, (E, 1, H), dtype=jnp.float32),
        "w2": 0.1 * jax.random.normal(k2, (E, H, D), dtype=jnp.float32),
        "b2": 0.1 * jax.random.normal(kb2, (E, 1, D), dtype=jnp.float32),
    }

    # 1) float32 path (accumulates directly into the output block).
    out = jax.block_until_ready(dense_moe_forward(x, params, threshold=0.5))
    ref = dense_moe_reference(x, params, threshold=0.5)
    np.testing.assert_allclose(np.asarray(out), np.asarray(ref),
                               rtol=1e-4, atol=1e-4)

    # 2) bf16 weight/activation streaming, f32 accumulation, f32 output.
    out_bf = jax.block_until_ready(
        dense_moe_forward(x, params, threshold=0.5,
                          compute_dtype=jnp.bfloat16))
    ref_bf = dense_moe_reference(x, params, threshold=0.5,
                                 compute_dtype=jnp.bfloat16)
    np.testing.assert_allclose(np.asarray(out_bf), np.asarray(ref_bf),
                               rtol=3e-2, atol=3e-2)

    # 3) bf16 input/output path (exercises the f32 scratch accumulator).
    x_bf = x.astype(jnp.bfloat16)
    out_b16 = jax.block_until_ready(
        dense_moe_forward(x_bf, params, threshold=0.5))
    ref_b16 = dense_moe_reference(x_bf, params, threshold=0.5)
    np.testing.assert_allclose(
        np.asarray(out_b16.astype(jnp.float32)),
        np.asarray(ref_b16.astype(jnp.float32)),
        rtol=3e-2, atol=3e-2)

    print("KERNEL_OK")
</pallas_src>

<mosaic_0001>
module attributes {stable_mosaic.version = 11 : i64} {
  func.func @_moe_kernel(%arg0: i32, %arg1: i32, %arg2: memref<4xi32, #tpu.memory_space<smem>>, %arg3: memref<1x128x1xf32, #tpu.memory_space<vmem>>, %arg4: memref<128x128xf32, #tpu.memory_space<vmem>>, %arg5: memref<1x128x512xf32, #tpu.memory_space<vmem>>, %arg6: memref<1x1x512xf32, #tpu.memory_space<vmem>>, %arg7: memref<1x512x128xf32, #tpu.memory_space<vmem>>, %arg8: memref<1x1x128xf32, #tpu.memory_space<vmem>>, %arg9: memref<128x128xf32, #tpu.memory_space<vmem>>) attributes {dimension_semantics = [#tpu.dimension_semantics<parallel>, #tpu.dimension_semantics<arbitrary>], iteration_bounds = array<i64: 1, 4>, scalar_prefetch = 1 : i64, scratch_operands = 0 : i64, tpu.core_type = #tpu.core_type<tc>, window_params = [{transform_indices = @transform_0, window_bounds = array<i64: 1, 128, 1>}, {transform_indices = @transform_1, window_bounds = array<i64: 128, 128>}, {transform_indices = @transform_2, window_bounds = array<i64: 1, 128, 512>}, {transform_indices = @transform_3, window_bounds = array<i64: 1, 1, 512>}, {transform_indices = @transform_4, window_bounds = array<i64: 1, 512, 128>}, {transform_indices = @transform_5, window_bounds = array<i64: 1, 1, 128>}, {transform_indices = @transform_6, window_bounds = array<i64: 128, 128>}]} {
    %c0_i32 = arith.constant 0 : i32
    %0 = arith.cmpi eq, %arg1, %c0_i32 : i32
    %1 = arith.extui %0 : i1 to i32
    %c0_i32_0 = arith.constant 0 : i32
    %2 = arith.cmpi ne, %1, %c0_i32_0 : i32
    scf.if %2 {
      %cst = arith.constant 0.000000e+00 : f32
      %10 = vector.broadcast %cst : f32 to vector<128x128xf32>
      %c0 = arith.constant 0 : index
      %c0_3 = arith.constant 0 : index
      %11 = vector.load %arg9[%c0, %c0_3] : memref<128x128xf32, #tpu.memory_space<vmem>>, vector<128x128xf32>
      tpu.vector_store %arg9[%c0, %c0_3], %10 {strides = array<i32>} : memref<128x128xf32, #tpu.memory_space<vmem>>, vector<128x128xf32>,
    } else {
    }
    %c4_i32 = arith.constant 4 : i32
    %3 = arith.muli %arg0, %c4_i32 : i32
    %4 = arith.addi %3, %arg1 : i32
    %5 = arith.index_cast %4 : i32 to index
    %6 = memref.load %arg2[%5] : memref<4xi32, #tpu.memory_space<smem>>
    %c0_i32_1 = arith.constant 0 : i32
    %7 = arith.cmpi ne, %6, %c0_i32_1 : i32
    %8 = arith.extui %7 : i1 to i32
    %c0_i32_2 = arith.constant 0 : i32
    %9 = arith.cmpi ne, %8, %c0_i32_2 : i32
    scf.if %9 {
      %c0 = arith.constant 0 : index
      %c0_3 = arith.constant 0 : index
      %c0_4 = arith.constant 0 : index
      %10 = vector.load %arg5[%c0, %c0_3, %c0_4] : memref<1x128x512xf32, #tpu.memory_space<vmem>>, vector<1x128x512xf32>
      %11 = vector.shape_cast %10 : vector<1x128x512xf32> to vector<128x512xf32>
      %c0_5 = arith.constant 0 : index
      %c0_6 = arith.constant 0 : index
      %c0_7 = arith.constant 0 : index
      %12 = vector.load %arg6[%c0_5, %c0_6, %c0_7] : memref<1x1x512xf32, #tpu.memory_space<vmem>>, vector<1x1x512xf32>
      %13 = vector.shape_cast %12 : vector<1x1x512xf32> to vector<1x512xf32>
      %c0_8 = arith.constant 0 : index
      %c0_9 = arith.constant 0 : index
      %c0_10 = arith.constant 0 : index
      %14 = vector.load %arg7[%c0_8, %c0_9, %c0_10] : memref<1x512x128xf32, #tpu.memory_space<vmem>>, vector<1x512x128xf32>
      %15 = vector.shape_cast %14 : vector<1x512x128xf32> to vector<512x128xf32>
      %c0_11 = arith.constant 0 : index
      %c0_12 = arith.constant 0 : index
      %c0_13 = arith.constant 0 : index
      %16 = vector.load %arg8[%c0_11, %c0_12, %c0_13] : memref<1x1x128xf32, #tpu.memory_space<vmem>>, vector<1x1x128xf32>
      %17 = vector.shape_cast %16 : vector<1x1x128xf32> to vector<1x128xf32>
      %c0_14 = arith.constant 0 : index
      %c0_15 = arith.constant 0 : index
      %18 = vector.load %arg4[%c0_14, %c0_15] : memref<128x128xf32, #tpu.memory_space<vmem>>, vector<128x128xf32>
      %cst = arith.constant dense<0.000000e+00> : vector<128x512xf32>
      %19 = tpu.matmul %18, %11, %cst {dimension_numbers = #tpu.dot_dimension_numbers<[1], [0], [0], [1], [0, 0, 1, 1], [], []>} : vector<128x128xf32>, vector<128x512xf32>, vector<128x512xf32> -> vector<128x512xf32>
      %20 = vector.broadcast %13 : vector<1x512xf32> to vector<128x512xf32>
      %21 = arith.addf %19, %20 : vector<128x512xf32>
      %cst_16 = arith.constant 0.000000e+00 : f32
      %22 = vector.broadcast %cst_16 : f32 to vector<128x512xf32>
      %23 = arith.maximumf %21, %22 : vector<128x512xf32>
      %cst_17 = arith.constant dense<0.000000e+00> : vector<128x128xf32>
      %24 = tpu.matmul %23, %15, %cst_17 {dimension_numbers = #tpu.dot_dimension_numbers<[1], [0], [0], [1], [0, 0, 1, 1], [], []>} : vector<128x512xf32>, vector<512x128xf32>, vector<128x128xf32> -> vector<128x128xf32>
      %25 = vector.broadcast %17 : vector<1x128xf32> to vector<128x128xf32>
      %26 = arith.addf %24, %25 : vector<128x128xf32>
      %c0_18 = arith.constant 0 : index
      %c0_19 = arith.constant 0 : index
      %c0_20 = arith.constant 0 : index
      %27 = vector.load %arg3[%c0_18, %c0_19, %c0_20] : memref<1x128x1xf32, #tpu.memory_space<vmem>>, vector<1x128x1xf32>
      %28 = vector.shape_cast %27 : vector<1x128x1xf32> to vector<128x1xf32>
      %c0_21 = arith.constant 0 : index
      %c0_22 = arith.constant 0 : index
      %29 = vector.load %arg9[%c0_21, %c0_22] : memref<128x128xf32, #tpu.memory_space<vmem>>, vector<128x128xf32>
      %30 = vector.broadcast %28 : vector<128x1xf32> to vector<128x128xf32>
      %31 = arith.mulf %30, %26 : vector<128x128xf32>
      %32 = arith.addf %29, %31 : vector<128x128xf32>
      %c0_23 = arith.constant 0 : index
      %c0_24 = arith.constant 0 : index
      %33 = vector.load %arg9[%c0_23, %c0_24] : memref<128x128xf32, #tpu.memory_space<vmem>>, vector<128x128xf32>
      tpu.vector_store %arg9[%c0_23, %c0_24], %32 {strides = array<i32>} : memref<128x128xf32, #tpu.memory_space<vmem>>, vector<128x128xf32>,
    } else {
    }
    return
  }
  func.func @transform_0(%arg0: i32, %arg1: i32, %arg2: memref<4xi32, #tpu.memory_space<smem>>) -> (i32, i32, i32) {
    %c0_i32 = arith.constant 0 : i32
    %c0_i32_0 = arith.constant 0 : i32
    return %arg1, %arg0, %c0_i32 : i32, i32, i32
  }
  func.func @transform_1(%arg0: i32, %arg1: i32, %arg2: memref<4xi32, #tpu.memory_space<smem>>) -> (i32, i32) {
    %c0_i32 = arith.constant 0 : i32
    %c0_i32_0 = arith.constant 0 : i32
    return %arg0, %c0_i32 : i32, i32
  }
  func.func @transform_2(%arg0: i32, %arg1: i32, %arg2: memref<4xi32, #tpu.memory_space<smem>>) -> (i32, i32, i32) {
    %c0_i32 = arith.constant 0 : i32
    %c0_i32_0 = arith.constant 0 : i32
    %c0_i32_1 = arith.constant 0 : i32
    return %arg1, %c0_i32, %c0_i32_0 : i32, i32, i32
  }
  func.func @transform_3(%arg0: i32, %arg1: i32, %arg2: memref<4xi32, #tpu.memory_space<smem>>) -> (i32, i32, i32) {
    %c0_i32 = arith.constant 0 : i32
    %c0_i32_0 = arith.constant 0 : i32
    %c0_i32_1 = arith.constant 0 : i32
    return %arg1, %c0_i32, %c0_i32_0 : i32, i32, i32
  }
  func.func @transform_4(%arg0: i32, %arg1: i32, %arg2: memref<4xi32, #tpu.memory_space<smem>>) -> (i32, i32, i32) {
    %c0_i32 = arith.constant 0 : i32
    %c0_i32_0 = arith.constant 0 : i32
    %c0_i32_1 = arith.constant 0 : i32
    return %arg1, %c0_i32, %c0_i32_0 : i32, i32, i32
  }
  func.func @transform_5(%arg0: i32, %arg1: i32, %arg2: memref<4xi32, #tpu.memory_space<smem>>) -> (i32, i32, i32) {
    %c0_i32 = arith.constant 0 : i32
    %c0_i32_0 = arith.constant 0 : i32
    %c0_i32_1 = arith.constant 0 : i32
    return %arg1, %c0_i32, %c0_i32_0 : i32, i32, i32
  }
  func.func @transform_6(%arg0: i32, %arg1: i32, %arg2: memref<4xi32, #tpu.memory_space<smem>>) -> (i32, i32) {
    %c0_i32 = arith.constant 0 : i32
    %c0_i32_0 = arith.constant 0 : i32
    return %arg0, %c0_i32 : i32, i32
  }
}

</mosaic_0001>

<bundles_post_ra>
// kernel: tpu_custom_call.1
= control target key start
LH: loop header
LB: loop body
LE: loop exit
PB: predicated region body
PF: predicated region fallthrough
CT: control target
= control target key end

     0   :  { %s2559_s0 = inlined_call_operand.vmem [shape: s32[4], index: 0, kind: input, shape index: {}]   ;;  %s2560_s1 = inlined_call_operand.vmem [shape: f32[4,128,1], index: 1, kind: input, shape index: {}]   ;;  %s2561_s2 = inlined_call_operand.vmem [shape: f32[128,128], index: 2, kind: input, shape index: {}]   ;;  %s2562_s3 = inlined_call_operand.hbm [shape: f32[4,128,512], index: 3, kind: input, shape index: {}]   ;;  %s2563_s4 = inlined_call_operand.vmem [shape: f32[4,1,512], index: 4, kind: input, shape index: {}]   ;;  %s2564_s5 = inlined_call_operand.hbm [shape: f32[4,512,128], index: 5, kind: input, shape index: {}]   ;;  %s2565_s6 = inlined_call_operand.vmem [shape: f32[4,1,128], index: 6, kind: input, shape index: {}]   ;;  %s2566_s7 = inlined_call_operand.hbm [shape: f32[128,128], index: 7, kind: output, shape index: {}]  }
   0x1   :  { %2568 = sst [smem:[#allocation14_spill]] %s2562_s3  ;;  %s12_s26 = sshll.u32 %s2559_s0, 4  ;;  %s13_s26 = int_to_ptr.vmem [resolvable:$true] %s12_s26 }
   0x2   :  { %s1863_s27 = scalar_lea.vmem %s13_s26, 16  ;;  %p1868_p1 = scmp.lt.s32.totalorder %s13_s26, %s13_s26 }
   0x3   :  { %p1864_p0 = scmp.ne.s32.totalorder %s13_s26, %s1863_s27  ;;  %p1869_p2 = scmp.lt.s32.totalorder %s1863_s27, %s1863_s27 }
   0x5   :  { %p1870_p3 = por %p1869_p2, %p1868_p1 }
   0x7   :  { %p1871_p4 = pnand %p1870_p3, %p1864_p0 }
   0x9   :  { %1874 = shalt.err (!%p1871_p4)  }
   0xa   :  { %s2017_s28 = smov [#allocation3]  }
   0xb   :  { %15 = dma.vmem_to_smem %s13_s26, 16, %s2017_s28, [#allocation2] }
   0xc   :  { %1979 = dma.done.wait [#allocation2], 16 }
   0xd   :  { %1980 = vsyncadd [#allocation2], 4294967280 }
   0xe   :  { %17 = sfence }
   0xf   :  { %18 = vsyncpa [#allocation5], 0 }
  0x10   :  { %20 = vsyncpa [#allocation5 + $0x1], 0 }
  0x11   :  { %21 = vsyncpa [#allocation8], 0 }
  0x12   :  { %23 = vsyncpa [#allocation8 + $0x1], 0 }
  0x13   :  { %24 = vsyncpa [#allocation6], 0  ;;  %s2073_s29 = smov 0   ;;  %s2075_s0 = smov 0  }
  0x14   :  { %s2077_s30 = smov 0   ;;  %s2079_s8 = smov 0  }
  0x15   :  { %s2081_s9 = smov 0   ;;  %s2083_s10 = smov 0  }
  0x16 LB: > { %s2567_s11 = sadd.s32 4294967295, %s2015_s10   ;;  %s39_s12 = sadd.s32 1, %s2011_s9  ;;  %s2015_s10 = sphi %s2083_s10, %s30_s10   ;;  %s2011_s9 = sphi %s2081_s9, %s2580_s9   ;;  %s2007_s8 = sphi %s2079_s8, %s2579_s8   ;;  %s2003_s30 = sphi %s2077_s30, %s2578_s30   ;;  %s1999_s0 = sphi %s2075_s0, %s2577_s0   ;;  %s1995_s29 = sphi %s2073_s29, %s2576_s29  }
  0x17   : > { %p40_p5 = scmp.ge.s32.totalorder %s39_s12, 4  ;;  %s103_s13 = sadd.s32 1, %s2003_s30 }
  0x18   : > { %p110_p6 = scmp.ne.s32.totalorder %s2003_s30, %s1999_s0  ;;  %p111_p7 = scmp.eq.s32.totalorder %s2015_s10, 0 }
  0x19   : > { %s2582_s12 = smov (%p40_p5, %s39_s12), 0  ;;  %p116_p9 = scmp.ne.s32.totalorder %s1999_s0, %s1995_s29 }
  0x1a   : > { %p2109_p8 = por %p111_p7, %p110_p6  ;;  %s100_s15 = ssub.s32 %s2011_s9, %s2582_s12 }
  0x1b   : > { %p117_p10 = scmp.eq.s32.totalorder %s2567_s11, 0  ;;  %p101_p11 = scmp.eq.s32.totalorder %s100_s15, 0 }
  0x1c   : > { %p1799_p13 = scmp.lt.s32.totalorder %s2015_s10, 4  ;;  %s2127_s18 = sand.u32 1, %s2003_s30  }
  0x1d   : > { %p2118_p12 = por %p117_p10, %p116_p9  ;;  %s1621_s19 = sshll.u32 %s2011_s9, 13 }
  0x1e   : > { %s2124_s17 = scalar_select %p101_p11, %s2003_s30, %s103_s13  }
  0x1f   : > { %s1602_s20 = sshll.u32 %s2127_s18, 9  ;;  %s2571_s3 = sld [smem:[#allocation14_spill]] }
  0x20   : > { %s270_s24 = scalar_lea.vmem [#allocation4], %s1602_s20  ;;  %p2138_p0 = pnand %p1799_p13, %p2109_p8 }
  0x21   : > { %s277_s25 = sshll.u32 %s270_s24, 4  ;;  %s267_s27 = scalar_lea.sflag [#allocation5], %s2127_s18  ;;  %s278_s25 = int_to_ptr.vmem [resolvable:$true] %s277_s25 }
  0x22   : > { %p1877_p1 = pneg %p2138_p0  ;;  %s1888_s28 = scalar_lea.vmem %s278_s25, 8192 }
  0x23   : > { %p1889_p2 = scmp.ne.s32.totalorder %s278_s25, %s1888_s28  ;;  %s2018_s29 = smov [#allocation4]  }
  0x24   : > { %s1893_s13 = sshll.u32 %s2018_s29, 4  ;;  %s1894_s13 = int_to_ptr.vmem [resolvable:$false] %s1893_s13 }
  0x25   : > { %s276_s23 = scalar_lea.hbm %s2571_s3, %s1621_s19  ;;  %p1891_p3 = pnand %p1889_p2, %p1877_p1 }
  0x26   : > { %s1895_s14 = scalar_lea.vmem %s1894_s13, 16384  ;;  %p1896_p5 = scmp.lt.s32.totalorder %s278_s25, %s1894_s13 }
  0x27   : > { %p1892_p4 = pneg %p1891_p3  ;;  %p1897_p6 = scmp.lt.s32.totalorder %s1895_s14, %s1888_s28 }
  0x29   : > { %p1898_p7 = por %p1897_p6, %p1896_p5 }
  0x2b   : > { %p1899_p8 = pnand %p1898_p7, %p1892_p4 }
  0x2d   : > { %1902 = shalt.err (!%p1899_p8)
}
  0x2e   : > { %s2019_s15 = smov 512   ;;  %s2020_s21 = smov 32  }
  0x2f   : > { %1795 = dma.hbm_to_vmem [thread:$0]  (!%p2138_p0), %s276_s23, 8192, %s278_s25, %s267_s27, %s2019_s15, %s2019_s15, %s2020_s21  }
  0x30   : > { %p1608_p9 = scmp.ge.s32.totalorder %s2015_s10, 1  ;;  %p319_p10 = scmp.lt.s32.totalorder %s2015_s10, 5 }
  0x31   : > { %s304_s29 = scalar_lea.hbm %s2564_s5, %s1621_s19  ;;  %s298_s13 = scalar_lea.vmem [#allocation7], %s1602_s20 }
  0x32   : > { %p2152_p11 = pnand %p1608_p9, %p319_p10  ;;  %s305_s14 = sshll.u32 %s298_s13, 4  ;;  %s306_s14 = int_to_ptr.vmem [resolvable:$true] %s305_s14 }
  0x33   : > { %s295_s11 = scalar_lea.sflag [#allocation8], %s2127_s18  ;;  %s1916_s3 = scalar_lea.vmem %s306_s14, 8192 }
  0x34   : > { %p1917_p13 = scmp.ne.s32.totalorder %s306_s14, %s1916_s3  ;;  %s2021_s23 = smov [#allocation7]  }
  0x35   : > { %s1921_s25 = sshll.u32 %s2021_s23, 4  ;;  %s1922_s25 = int_to_ptr.vmem [resolvable:$false] %s1921_s25 }
  0x36   : > { %p1919_p2 = pnand %p1917_p13, %p1877_p1  ;;  %s1923_s27 = scalar_lea.vmem %s1922_s25, 16384 }
  0x37   : > { %p1924_p4 = scmp.lt.s32.totalorder %s306_s14, %s1922_s25  ;;  %p1925_p5 = scmp.lt.s32.totalorder %s1923_s27, %s1916_s3 }
  0x38   : > { %p1920_p3 = pneg %p1919_p2 }
  0x39   : > { %p1926_p6 = por %p1925_p5, %p1924_p4 }
  0x3b   : > { %p1927_p7 = pnand %p1926_p6, %p1920_p3 }
  0x3d   : > { %1930 = shalt.err (!%p1927_p7)
}
  0x3e   : > { %s2022_s19 = smov 128   ;;  %s2023_s20 = smov 8  }
  0x3f   : > { %1798 = dma.hbm_to_vmem [thread:$0]  (!%p2138_p0), %s304_s29, 8192, %s306_s14, %s295_s11, %s2022_s19, %s2022_s19, %s2023_s20  }
  0x40   : > { %323 = sbr.rel (%p2152_p11) target bundleno = 618 (0x26a), region = 44  ;;  %s325_s18 = sand.u32 (!%p2152_p11), 1, %s1999_s0  }
  0x41   : > { %s1609_s15 = sshll.u32 (!%p2152_p11), %s325_s18, 9  ;;  %s326_s21 = scalar_lea.sflag (!%p2152_p11), [#allocation5], %s325_s18 }
  0x42   : > { %s2170_s24 = scalar_lea.vmem (!%p2152_p11), [#allocation4], %s1609_s15 }
  0x45   : > { %1982 = dma.done.wait (%p2118_p12), %s326_s21, 8192  }
  0x46   : > { %1984 = vsyncadd (%p2118_p12), %s326_s21, 4294959104  ;;  %s335_s3 = scalar_lea.sflag [#allocation8], %s325_s18  ;;  %s2176_s28 = scalar_lea.vmem [#allocation7], %s1609_s15 }
  0x47   : > { %1986 = dma.done.wait (%p2118_p12), %s335_s3, 8192  }
  0x48   : > { %1988 = vsyncadd (%p2118_p12), %s335_s3, 4294959104  ;;  %p389_p0 = scmp.lt.s32.totalorder %s2007_s8, 3  ;;  %p1614_p12 = scmp.ne.s32.totalorder %s2007_s8, 0 }
  0x4a   : > { %s2184_s11 = scalar_select %p389_p0, %s2007_s8, 3 }
  0x4b   : > { %415 = sbr.rel (%p1614_p12) target bundleno = 89 (0x59), region = 56 }
  0x4c   : > { %s1623_s26 = sshll.u32 %s2184_s11, 7  ;;  %s1613_s22 = sshll.u32 %s2184_s11, 2 }
  0x4d   : > { %s2191_s14 = scalar_lea.vmem %s2560_s1, %s1623_s26  ;;  %s2196_s16 = scalar_lea.vmem %s2563_s4, %s1613_s22 }
  0x4e   : > { %s410_s20 = scalar_lea.vmem %s2565_s6, %s2184_s11 }
  0x50   : > { %v2024_v0 = vmov 0.0  }
  0x51   : > { %416 = vst [vmem:[#allocation9] sm:$0xff] %v2024_v0  ;;  %417 = vst [vmem:[#allocation9 + $0x8] sm:$0xff] %v2024_v0 }
  0x52   : > { %418 = vst [vmem:[#allocation9 + $0x10] sm:$0xff] %v2024_v0  ;;  %419 = vst [vmem:[#allocation9 + $0x18] sm:$0xff] %v2024_v0 }
  0x53   : > { %420 = vst [vmem:[#allocation9 + $0x20] sm:$0xff] %v2024_v0  ;;  %421 = vst [vmem:[#allocation9 + $0x28] sm:$0xff] %v2024_v0 }
  0x54   : > { %422 = vst [vmem:[#allocation9 + $0x30] sm:$0xff] %v2024_v0  ;;  %423 = vst [vmem:[#allocation9 + $0x38] sm:$0xff] %v2024_v0 }
  0x55   : > { %424 = vst [vmem:[#allocation9 + $0x40] sm:$0xff] %v2024_v0  ;;  %425 = vst [vmem:[#allocation9 + $0x48] sm:$0xff] %v2024_v0 }
  0x56   : > { %426 = vst [vmem:[#allocation9 + $0x50] sm:$0xff] %v2024_v0  ;;  %427 = vst [vmem:[#allocation9 + $0x58] sm:$0xff] %v2024_v0 }
  0x57   : > { %428 = vst [vmem:[#allocation9 + $0x60] sm:$0xff] %v2024_v0  ;;  %429 = vst [vmem:[#allocation9 + $0x68] sm:$0xff] %v2024_v0 }
  0x58   : > { %430 = vst [vmem:[#allocation9 + $0x70] sm:$0xff] %v2024_v0  ;;  %431 = vst [vmem:[#allocation9 + $0x78] sm:$0xff] %v2024_v0 }
  0x59 PF: > { %s434_s18 = sld [smem:[#allocation3 + %s2007_s8]] }
  0x5f   : > { %p1615_p1 = scmp.eq.s32.totalorder %s434_s18, 0 }
  0x61   : > { %438 = sbr.rel (%p1615_p1) target bundleno = 602 (0x25a), region = 60 }
  0x66   : > { %v500_v1 = vld [vmem:[%s2170_s24 + $0x1e8] sm:$0xff]  ;;  %v502_v2 = vld [vmem:[%s2170_s24 + $0x1f8] sm:$0xff]  ;;  %v499_v3 = vld [vmem:[%s2170_s24 + $0x1e0] sm:$0xff] }
  0x67   : > { %606 = vmatprep.subr.mxu0 %v500_v1  ;;  %767 = vmatprep.subr.mxu1 %v502_v2  ;;  %v501_v4 = vld [vmem:[%s2170_s24 + $0x1f0] sm:$0xff]  ;;  %v496_v5 = vld [vmem:[%s2170_s24 + $0x1c8] sm:$0xff]  ;;  %v498_v6 = vld [vmem:[%s2170_s24 + $0x1d8] sm:$0xff]  ;;  %v2025_v2 = vmov 0.0  }
  0x68   : > { %607 = vmatpush1.msra.mxu0 %v499_v3  ;;  %768 = vmatpush1.msra.mxu1 %v501_v4  ;;  %v495_v7 = vld [vmem:[%s2170_s24 + $0x1c0] sm:$0xff]  ;;  %v497_v8 = vld [vmem:[%s2170_s24 + $0x1d0] sm:$0xff]  ;;  %v492_v9 = vld [vmem:[%s2170_s24 + $0x1a8] sm:$0xff] }
  0x69   : > { %608 = vmatprep.subr.mxu0 %v496_v5  ;;  %769 = vmatprep.subr.mxu1 %v498_v6  ;;  %v494_v10 = vld [vmem:[%s2170_s24 + $0x1b8] sm:$0xff]  ;;  %v491_v11 = vld [vmem:[%s2170_s24 + $0x1a0] sm:$0xff]  ;;  %v493_v12 = vld [vmem:[%s2170_s24 + $0x1b0] sm:$0xff] }
  0x6a   : > { %609 = vmatpush1.msra.mxu0 %v495_v7  ;;  %770 = vmatpush1.msra.mxu1 %v497_v8  ;;  %v488_v13 = vld [vmem:[%s2170_s24 + $0x188] sm:$0xff]  ;;  %v490_v14 = vld [vmem:[%s2170_s24 + $0x198] sm:$0xff]  ;;  %v487_v15 = vld [vmem:[%s2170_s24 + $0x180] sm:$0xff] }
  0x6b   : > { %610 = vmatprep.subr.mxu0 %v492_v9  ;;  %771 = vmatprep.subr.mxu1 %v494_v10  ;;  %v489_v16 = vld [vmem:[%s2170_s24 + $0x190] sm:$0xff]  ;;  %v484_v17 = vld [vmem:[%s2170_s24 + $0x168] sm:$0xff]  ;;  %v486_v18 = vld [vmem:[%s2170_s24 + $0x178] sm:$0xff] }
  0x6c   : > { %611 = vmatpush1.msra.mxu0 %v491_v11  ;;  %772 = vmatpush1.msra.mxu1 %v493_v12  ;;  %v483_v19 = vld [vmem:[%s2170_s24 + $0x160] sm:$0xff]  ;;  %v485_v20 = vld [vmem:[%s2170_s24 + $0x170] sm:$0xff]  ;;  %v480_v21 = vld [vmem:[%s2170_s24 + $0x148] sm:$0xff] }
  0x6d   : > { %612 = vmatprep.subr.mxu0 %v488_v13  ;;  %773 = vmatprep.subr.mxu1 %v490_v14  ;;  %v482_v22 = vld [vmem:[%s2170_s24 + $0x158] sm:$0xff]  ;;  %v479_v23 = vld [vmem:[%s2170_s24 + $0x140] sm:$0xff]  ;;  %v481_v24 = vld [vmem:[%s2170_s24 + $0x150] sm:$0xff] }
  0x6e   : > { %613 = vmatpush1.msra.mxu0 %v487_v15  ;;  %774 = vmatpush1.msra.mxu1 %v489_v16  ;;  %v476_v25 = vld [vmem:[%s2170_s24 + $0x128] sm:$0xff]  ;;  %v478_v26 = vld [vmem:[%s2170_s24 + $0x138] sm:$0xff]  ;;  %v475_v27 = vld [vmem:[%s2170_s24 + $0x120] sm:$0xff] }
  0x6f   : > { %614 = vmatprep.subr.mxu0 %v484_v17  ;;  %775 = vmatprep.subr.mxu1 %v486_v18  ;;  %v477_v28 = vld [vmem:[%s2170_s24 + $0x130] sm:$0xff]  ;;  %v472_v29 = vld [vmem:[%s2170_s24 + $0x108] sm:$0xff]  ;;  %v474_v30 = vld [vmem:[%s2170_s24 + $0x118] sm:$0xff] }
  0x70   : > { %615 = vmatpush1.msra.mxu0 %v483_v19  ;;  %776 = vmatpush1.msra.mxu1 %v485_v20  ;;  %v471_v31 = vld [vmem:[%s2170_s24 + $0x100] sm:$0xff]  ;;  %v473_v32 = vld [vmem:[%s2170_s24 + $0x110] sm:$0xff]  ;;  %v468_v33 = vld [vmem:[%s2170_s24 + $0xe8] sm:$0xff] }
  0x71   : > { %616 = vmatprep.subr.mxu0 %v480_v21  ;;  %777 = vmatprep.subr.mxu1 %v482_v22  ;;  %v470_v34 = vld [vmem:[%s2170_s24 + $0xf8] sm:$0xff]  ;;  %v467_v35 = vld [vmem:[%s2170_s24 + $0xe0] sm:$0xff]  ;;  %v469_v36 = vld [vmem:[%s2170_s24 + $0xf0] sm:$0xff] }
  0x72   : > { %617 = vmatpush1.msra.mxu0 %v479_v23  ;;  %778 = vmatpush1.msra.mxu1 %v481_v24  ;;  %v464_v37 = vld [vmem:[%s2170_s24 + $0xc8] sm:$0xff]  ;;  %v466_v38 = vld [vmem:[%s2170_s24 + $0xd8] sm:$0xff]  ;;  %v463_v39 = vld [vmem:[%s2170_s24 + $0xc0] sm:$0xff] }
  0x73   : > { %618 = vmatprep.subr.mxu0 %v476_v25  ;;  %779 = vmatprep.subr.mxu1 %v478_v26  ;;  %v465_v40 = vld [vmem:[%s2170_s24 + $0xd0] sm:$0xff]  ;;  %v460_v41 = vld [vmem:[%s2170_s24 + $0xa8] sm:$0xff]  ;;  %v462_v42 = vld [vmem:[%s2170_s24 + $0xb8] sm:$0xff] }
  0x74   : > { %619 = vmatpush1.msra.mxu0 %v475_v27  ;;  %780 = vmatpush1.msra.mxu1 %v477_v28  ;;  %v459_v43 = vld [vmem:[%s2170_s24 + $0xa0] sm:$0xff]  ;;  %v461_v44 = vld [vmem:[%s2170_s24 + $0xb0] sm:$0xff]  ;;  %v456_v45 = vld [vmem:[%s2170_s24 + $0x88] sm:$0xff] }
  0x75   : > { %620 = vmatprep.subr.mxu0 %v472_v29  ;;  %781 = vmatprep.subr.mxu1 %v474_v30  ;;  %v458_v46 = vld [vmem:[%s2170_s24 + $0x98] sm:$0xff]  ;;  %v455_v47 = vld [vmem:[%s2170_s24 + $0x80] sm:$0xff]  ;;  %v457_v48 = vld [vmem:[%s2170_s24 + $0x90] sm:$0xff] }
  0x76   : > { %621 = vmatpush1.msra.mxu0 %v471_v31  ;;  %782 = vmatpush1.msra.mxu1 %v473_v32  ;;  %v452_v49 = vld [vmem:[%s2170_s24 + $0x68] sm:$0xff]  ;;  %v454_v50 = vld [vmem:[%s2170_s24 + $0x78] sm:$0xff]  ;;  %v451_v51 = vld [vmem:[%s2170_s24 + $0x60] sm:$0xff] }
  0x77   : > { %622 = vmatprep.subr.mxu0 %v468_v33  ;;  %783 = vmatprep.subr.mxu1 %v470_v34  ;;  %v453_v52 = vld [vmem:[%s2170_s24 + $0x70] sm:$0xff]  ;;  %v448_v53 = vld [vmem:[%s2170_s24 + $0x48] sm:$0xff]  ;;  %v450_v54 = vld [vmem:[%s2170_s24 + $0x58] sm:$0xff] }
  0x78   : > { %623 = vmatpush1.msra.mxu0 %v467_v35  ;;  %784 = vmatpush1.msra.mxu1 %v469_v36  ;;  %v447_v55 = vld [vmem:[%s2170_s24 + $0x40] sm:$0xff]  ;;  %v449_v56 = vld [vmem:[%s2170_s24 + $0x50] sm:$0xff]  ;;  %v444_v57 = vld [vmem:[%s2170_s24 + $0x28] sm:$0xff] }
  0x79   : > { %624 = vmatprep.subr.mxu0 %v464_v37  ;;  %785 = vmatprep.subr.mxu1 %v466_v38  ;;  %v446_v58 = vld [vmem:[%s2170_s24 + $0x38] sm:$0xff]  ;;  %v443_v59 = vld [vmem:[%s2170_s24 + $0x20] sm:$0xff]  ;;  %v445_v60 = vld [vmem:[%s2170_s24 + $0x30] sm:$0xff] }
  0x7a   : > { %625 = vmatpush1.msra.mxu0 %v463_v39  ;;  %786 = vmatpush1.msra.mxu1 %v465_v40  ;;  %v440_v61 = vld [vmem:[%s2170_s24 + $0x8] sm:$0xff]  ;;  %v442_v62 = vld [vmem:[%s2170_s24 + $0x18] sm:$0xff]  ;;  %v439_v63 = vld [vmem:[%s2170_s24] sm:$0xff] }
  0x7b   : > { %626 = vmatprep.subr.mxu0 %v460_v41  ;;  %787 = vmatprep.subr.mxu1 %v462_v42  ;;  %v441_v0 = vld [vmem:[%s2170_s24 + $0x10] sm:$0xff]  ;;  %v569_v1 = vld [vmem:[%s2561_s2] sm:$0xff]  ;;  %v535_v3 = vld [vmem:[%s2176_s28 + $0xf8] sm:$0xff] }
  0x7c   : > { %627 = vmatpush1.msra.mxu0 %v459_v43  ;;  %788 = vmatpush1.msra.mxu1 %v461_v44  ;;  %v567_v4 = vld [vmem:[%s2176_s28 + $0x1f8] sm:$0xff]  ;;  %v570_v7 = vld [vmem:[%s2561_s2 + $0x8] sm:$0xff]  ;;  %v534_v8 = vld [vmem:[%s2176_s28 + $0xf0] sm:$0xff] }
  0x7d   : > { %628 = vmatprep.subr.mxu0 %v456_v45  ;;  %789 = vmatprep.subr.mxu1 %v458_v46  ;;  %v519_v5 = vld [vmem:[%s2176_s28 + $0x78] sm:$0xff]  ;;  %v566_v9 = vld [vmem:[%s2176_s28 + $0x1f0] sm:$0xff]  ;;  %v533_v13 = vld [vmem:[%s2176_s28 + $0xe8] sm:$0xff] }
  0x7e   : > { %629 = vmatpush1.msra.mxu0 %v455_v47  ;;  %790 = vmatpush1.msra.mxu1 %v457_v48  ;;  %v551_v6 = vld [vmem:[%s2176_s28 + $0x178] sm:$0xff]  ;;  %v518_v10 = vld [vmem:[%s2176_s28 + $0x70] sm:$0xff]  ;;  %v565_v14 = vld [vmem:[%s2176_s28 + $0x1e8] sm:$0xff] }
  0x7f   : > { %630 = vmatprep.subr.mxu0 %v452_v49  ;;  %791 = vmatprep.subr.mxu1 %v454_v50  ;;  %v550_v11 = vld [vmem:[%s2176_s28 + $0x170] sm:$0xff]  ;;  %v517_v15 = vld [vmem:[%s2176_s28 + $0x68] sm:$0xff]  ;;  %v572_v17 = vld [vmem:[%s2561_s2 + $0x18] sm:$0xff] }
  0x80   : > { %631 = vmatpush1.msra.mxu0 %v451_v51  ;;  %792 = vmatpush1.msra.mxu1 %v453_v52  ;;  %v571_v12 = vld [vmem:[%s2561_s2 + $0x10] sm:$0xff]  ;;  %v549_v16 = vld [vmem:[%s2176_s28 + $0x168] sm:$0xff]  ;;  %v532_v18 = vld [vmem:[%s2176_s28 + $0xe0] sm:$0xff] }
  0x81   : > { %632 = vmatprep.subr.mxu0 %v448_v53  ;;  %793 = vmatprep.subr.mxu1 %v450_v54  ;;  %v564_v19 = vld [vmem:[%s2176_s28 + $0x1e0] sm:$0xff]  ;;  %v531_v23 = vld [vmem:[%s2176_s28 + $0xd8] sm:$0xff]  ;;  %v574_v27 = vld [vmem:[%s2561_s2 + $0x28] sm:$0xff] }
  0x82   : > { %633 = vmatpush1.msra.mxu0 %v447_v55  ;;  %794 = vmatpush1.msra.mxu1 %v449_v56  ;;  %v516_v20 = vld [vmem:[%s2176_s28 + $0x60] sm:$0xff]  ;;  %v563_v24 = vld [vmem:[%s2176_s28 + $0x1d8] sm:$0xff]  ;;  %v530_v28 = vld [vmem:[%s2176_s28 + $0xd0] sm:$0xff] }
  0x83   : > { %634 = vmatprep.subr.mxu0 %v444_v57  ;;  %795 = vmatprep.subr.mxu1 %v446_v58  ;;  %v548_v21 = vld [vmem:[%s2176_s28 + $0x160] sm:$0xff]  ;;  %v515_v25 = vld [vmem:[%s2176_s28 + $0x58] sm:$0xff]  ;;  %v562_v29 = vld [vmem:[%s2176_s28 + $0x1d0] sm:$0xff] }
  0x84   : > { %635 = vmatpush1.msra.mxu0 %v443_v59  ;;  %796 = vmatpush1.msra.mxu1 %v445_v60  ;;  %v573_v22 = vld [vmem:[%s2561_s2 + $0x20] sm:$0xff]  ;;  %v547_v26 = vld [vmem:[%s2176_s28 + $0x158] sm:$0xff]  ;;  %v514_v30 = vld [vmem:[%s2176_s28 + $0x50] sm:$0xff] }
  0x85   : > { %636 = vmatprep.subr.mxu0 %v440_v61  ;;  %797 = vmatprep.subr.mxu1 %v442_v62  ;;  %v546_v31 = vld [vmem:[%s2176_s28 + $0x150] sm:$0xff]  ;;  %v529_v33 = vld [vmem:[%s2176_s28 + $0xc8] sm:$0xff]  ;;  %v576_v37 = vld [vmem:[%s2561_s2 + $0x38] sm:$0xff] }
  0x86   : > { %637 = vmatpush1.msra.mxu0 %v439_v63  ;;  %670 = vmatprep.mubr.f32.mxu0 %v2025_v2  ;;  %v575_v32 = vld [vmem:[%s2561_s2 + $0x30] sm:$0xff]  ;;  %v561_v34 = vld [vmem:[%s2176_s28 + $0x1c8] sm:$0xff]  ;;  %v528_v38 = vld [vmem:[%s2176_s28 + $0xc0] sm:$0xff] }
  0x87   : > { %798 = vmatpush1.msra.mxu1 %v441_v0  ;;  %831 = vmatprep.mubr.f32.mxu1 %v2025_v2  ;;  %v513_v35 = vld [vmem:[%s2176_s28 + $0x48] sm:$0xff]  ;;  %v560_v39 = vld [vmem:[%s2176_s28 + $0x1c0] sm:$0xff]  ;;  %v527_v43 = vld [vmem:[%s2176_s28 + $0xb8] sm:$0xff] }
  0x88   : > { %671 = vmatmul.mubr.f32.vlgmr.msra.gmra.mxu0 %v569_v1  ;;  %832 = vmatmul.mubr.f32.vlgmr.msra.gmra.mxu1 %v569_v1  ;;  %v545_v36 = vld [vmem:[%s2176_s28 + $0x148] sm:$0xff]  ;;  %v512_v40 = vld [vmem:[%s2176_s28 + $0x40] sm:$0xff]  ;;  %v559_v44 = vld [vmem:[%s2176_s28 + $0x1b8] sm:$0xff] }
  0x89   : > { %676 = vmatprep.mubr.f32.mxu0 %v2025_v2  ;;  %837 = vmatprep.mubr.f32.mxu1 %v2025_v2  ;;  %v544_v41 = vld [vmem:[%s2176_s28 + $0x140] sm:$0xff]  ;;  %v511_v45 = vld [vmem:[%s2176_s28 + $0x38] sm:$0xff]  ;;  %v578_v47 = vld [vmem:[%s2561_s2 + $0x48] sm:$0xff] }
  0x8a   : > { %1624 = vmatprep.subr.mxu0 %v535_v3  ;;  %1704 = vmatprep.subr.mxu1 %v567_v4  ;;  %v577_v42 = vld [vmem:[%s2561_s2 + $0x40] sm:$0xff]  ;;  %v543_v46 = vld [vmem:[%s2176_s28 + $0x138] sm:$0xff]  ;;  %v526_v48 = vld [vmem:[%s2176_s28 + $0xb0] sm:$0xff] }
  0x8b   : > { %1625 = vmatpush3.msra.mxu0 %v519_v5  ;;  %1705 = vmatpush3.msra.mxu1 %v551_v6  ;;  %v558_v49 = vld [vmem:[%s2176_s28 + $0x1b0] sm:$0xff]  ;;  %v525_v53 = vld [vmem:[%s2176_s28 + $0xa8] sm:$0xff]  ;;  %v580_v57 = vld [vmem:[%s2561_s2 + $0x58] sm:$0xff] }
  0x8c   : > { %677 = vmatmul.mubr.f32.gmra.mxu0 %v570_v7  ;;  %838 = vmatmul.mubr.f32.gmra.mxu1 %v570_v7  ;;  %v510_v50 = vld [vmem:[%s2176_s28 + $0x30] sm:$0xff]  ;;  %v557_v54 = vld [vmem:[%s2176_s28 + $0x1a8] sm:$0xff]  ;;  %v524_v58 = vld [vmem:[%s2176_s28 + $0xa0] sm:$0xff] }
  0x8d   : > { %682 = vmatprep.mubr.f32.mxu0 %v2025_v2  ;;  %843 = vmatprep.mubr.f32.mxu1 %v2025_v2  ;;  %v542_v51 = vld [vmem:[%s2176_s28 + $0x130] sm:$0xff]  ;;  %v509_v55 = vld [vmem:[%s2176_s28 + $0x28] sm:$0xff]  ;;  %v556_v59 = vld [vmem:[%s2176_s28 + $0x1a0] sm:$0xff] }
  0x8e   : > { %1626 = vmatprep.subr.mxu0 %v534_v8  ;;  %1706 = vmatprep.subr.mxu1 %v566_v9  ;;  %v579_v52 = vld [vmem:[%s2561_s2 + $0x50] sm:$0xff]  ;;  %v541_v56 = vld [vmem:[%s2176_s28 + $0x128] sm:$0xff]  ;;  %v508_v60 = vld [vmem:[%s2176_s28 + $0x20] sm:$0xff] }
  0x8f   : > { %1627 = vmatpush3.msra.mxu0 %v518_v10  ;;  %1707 = vmatpush3.msra.mxu1 %v550_v11  ;;  %v540_v61 = vld [vmem:[%s2176_s28 + $0x120] sm:$0xff]  ;;  %v523_v63 = vld [vmem:[%s2176_s28 + $0x98] sm:$0xff]  ;;  %v582_v4 = vld [vmem:[%s2561_s2 + $0x68] sm:$0xff] }
  0x90   : > { %683 = vmatmul.mubr.f32.gmra.mxu0 %v571_v12  ;;  %844 = vmatmul.mubr.f32.gmra.mxu1 %v571_v12  ;;  %v581_v62 = vld [vmem:[%s2561_s2 + $0x60] sm:$0xff]  ;;  %v555_v0 = vld [vmem:[%s2176_s28 + $0x198] sm:$0xff]  ;;  %v522_v5 = vld [vmem:[%s2176_s28 + $0x90] sm:$0xff] }
  0x91   : > { %688 = vmatprep.mubr.f32.mxu0 %v2025_v2  ;;  %849 = vmatprep.mubr.f32.mxu1 %v2025_v2  ;;  %v507_v1 = vld [vmem:[%s2176_s28 + $0x18] sm:$0xff]  ;;  %v554_v6 = vld [vmem:[%s2176_s28 + $0x190] sm:$0xff]  ;;  %v521_v10 = vld [vmem:[%s2176_s28 + $0x88] sm:$0xff] }
  0x92   : > { %1628 = vmatprep.subr.mxu0 %v533_v13  ;;  %1708 = vmatprep.subr.mxu1 %v565_v14  ;;  %v539_v3 = vld [vmem:[%s2176_s28 + $0x118] sm:$0xff]  ;;  %v506_v7 = vld [vmem:[%s2176_s28 + $0x10] sm:$0xff]  ;;  %v505_v12 = vld [vmem:[%s2176_s28 + $0x8] sm:$0xff] }
  0x93   : > { %1629 = vmatpush3.msra.mxu0 %v517_v15  ;;  %1709 = vmatpush3.msra.mxu1 %v549_v16  ;;  %v538_v8 = vld [vmem:[%s2176_s28 + $0x110] sm:$0xff]  ;;  %v584_v11 = vld [vmem:[%s2561_s2 + $0x78] sm:$0xff]  ;;  %v553_v13 = vld [vmem:[%s2176_s28 + $0x188] sm:$0xff] }
  0x94   : > { %689 = vmatmul.mubr.f32.gmra.mxu0 %v572_v17  ;;  %850 = vmatmul.mubr.f32.gmra.mxu1 %v572_v17  ;;  %v583_v9 = vld [vmem:[%s2561_s2 + $0x70] sm:$0xff]  ;;  %v537_v14 = vld [vmem:[%s2176_s28 + $0x108] sm:$0xff]  ;;  %v520_v15 = vld [vmem:[%s2176_s28 + $0x80] sm:$0xff] }
  0x95   : > { %694 = vmatprep.mubr.f32.mxu0 %v2025_v2  ;;  %855 = vmatprep.mubr.f32.mxu1 %v2025_v2  ;;  %v504_v16 = vld [vmem:[%s2176_s28] sm:$0xff] }
  0x96   : > { %1630 = vmatprep.subr.mxu0 %v532_v18  ;;  %1710 = vmatprep.subr.mxu1 %v564_v19  ;;  %v536_v17 = vld [vmem:[%s2176_s28 + $0x100] sm:$0xff]  ;;  %v1290_v19 = vld [vmem:[%s2191_s14 + $0x10] sm:$0xff] }
  0x97   : > { %1631 = vmatpush3.msra.mxu0 %v516_v20  ;;  %1711 = vmatpush3.msra.mxu1 %v548_v21  ;;  %v1288_v18 = vld [vmem:[%s2191_s14] sm:$0xff]  ;;  %v2026_v20 = vmov 0   ;;  %v1289_v21 = vld [vmem:[%s2191_s14 + $0x8] sm:$0xff] }
  0x98   : > { %695 = vmatmul.mubr.f32.gmra.mxu0 %v573_v22  ;;  %856 = vmatmul.mubr.f32.gmra.mxu1 %v573_v22  ;;  %v1291_v22 = vld [vmem:[%s2191_s14 + $0x18] sm:$0xff] }
  0x99   : > { %700 = vmatprep.mubr.f32.mxu0 %v2025_v2  ;;  %861 = vmatprep.mubr.f32.mxu1 %v2025_v2 }
  0x9a   : > { %1632 = vmatprep.subr.mxu0 %v531_v23  ;;  %1712 = vmatprep.subr.mxu1 %v563_v24  ;;  %v1293_v23 = vld [vmem:[%s2191_s14 + $0x28] sm:$0xff]  ;;  %v1292_v24 = vld [vmem:[%s2191_s14 + $0x20] sm:$0xff] }
  0x9b   : > { %1633 = vmatpush3.msra.mxu0 %v515_v25  ;;  %1713 = vmatpush3.msra.mxu1 %v547_v26  ;;  %v1295_v25 = vld [vmem:[%s2191_s14 + $0x38] sm:$0xff]  ;;  %v1294_v26 = vld [vmem:[%s2191_s14 + $0x30] sm:$0xff] }
  0x9c   : > { %701 = vmatmul.mubr.f32.gmra.mxu0 %v574_v27  ;;  %862 = vmatmul.mubr.f32.gmra.mxu1 %v574_v27  ;;  %v1297_v27 = vld [vmem:[%s2191_s14 + $0x48] sm:$0xff] }
  0x9d   : > { %706 = vmatprep.mubr.f32.mxu0 %v2025_v2  ;;  %867 = vmatprep.mubr.f32.mxu1 %v2025_v2 }
  0x9e   : > { %1634 = vmatprep.subr.mxu0 %v530_v28  ;;  %1714 = vmatprep.subr.mxu1 %v562_v29  ;;  %v1296_v28 = vld [vmem:[%s2191_s14 + $0x40] sm:$0xff]  ;;  %v1299_v29 = vld [vmem:[%s2191_s14 + $0x58] sm:$0xff] }
  0x9f   : > { %1635 = vmatpush3.msra.mxu0 %v514_v30  ;;  %1715 = vmatpush3.msra.mxu1 %v546_v31  ;;  %v1298_v30 = vld [vmem:[%s2191_s14 + $0x50] sm:$0xff]  ;;  %v1301_v31 = vld [vmem:[%s2191_s14 + $0x68] sm:$0xff] }
  0xa0   : > { %707 = vmatmul.mubr.f32.gmra.mxu0 %v575_v32  ;;  %868 = vmatmul.mubr.f32.gmra.mxu1 %v575_v32  ;;  %v1300_v32 = vld [vmem:[%s2191_s14 + $0x60] sm:$0xff] }
  0xa1   : > { %712 = vmatprep.mubr.f32.mxu0 %v2025_v2  ;;  %873 = vmatprep.mubr.f32.mxu1 %v2025_v2 }
  0xa2   : > { %1636 = vmatprep.subr.mxu0 %v529_v33  ;;  %1716 = vmatprep.subr.mxu1 %v561_v34  ;;  %v1303_v33 = vld [vmem:[%s2191_s14 + $0x78] sm:$0xff]  ;;  %v1302_v34 = vld [vmem:[%s2191_s14 + $0x70] sm:$0xff] }
  0xa3   : > { %1637 = vmatpush3.msra.mxu0 %v513_v35  ;;  %1717 = vmatpush3.msra.mxu1 %v545_v36  ;;  %v586_v35 = vlaneseq }
  0xa4   : > { %713 = vmatmul.mubr.f32.gmra.mxu0 %v576_v37  ;;  %874 = vmatmul.mubr.f32.gmra.mxu1 %v576_v37 }
  0xa5   : > { %718 = vmatprep.mubr.f32.mxu0 %v2025_v2  ;;  %879 = vmatprep.mubr.f32.mxu1 %v2025_v2  ;;  %v587_v36 = vshrl.u32 %v586_v35, 7 }
  0xa6   : > { %1638 = vmatprep.subr.mxu0 %v528_v38  ;;  %1718 = vmatprep.subr.mxu1 %v560_v39  ;;  %v503_v39 = vld [vmem:[%s2196_s16] sm:$0xf] }
  0xa7   : > { %1639 = vmatpush3.msra.mxu0 %v512_v40  ;;  %1719 = vmatpush3.msra.mxu1 %v544_v41  ;;  %v596_v37 = vsub.s32 2, %v587_v36  ;;  %v588_v38 = vsub.s32 0, %v587_v36  ;;  %v592_v40 = vsub.s32 1, %v587_v36  ;;  %v600_v41 = vsub.s32 3, %v587_v36 }
  0xa8   : > { %719 = vmatmul.mubr.f32.gmra.mxu0 %v577_v42  ;;  %880 = vmatmul.mubr.f32.gmra.mxu1 %v577_v42 }
  0xa9   : > { %724 = vmatprep.mubr.f32.mxu0 %v2025_v2  ;;  %885 = vmatprep.mubr.f32.mxu1 %v2025_v2  ;;  %v2429_v42 = vrot.slane %v503_v39, %v596_v37 }
  0xaa   : > { %1640 = vmatprep.subr.mxu0 %v527_v43  ;;  %1720 = vmatprep.subr.mxu1 %v559_v44  ;;  %v2431_v43 = vrot.slane %v503_v39, %v588_v38  ;;  %v2433_v44 = vrot.slane %v503_v39, %v592_v40 }
  0xab   : > { %1641 = vmatpush3.msra.mxu0 %v511_v45  ;;  %1721 = vmatpush3.msra.mxu1 %v543_v46  ;;  %v2435_v45 = vrot.slane %v503_v39, %v600_v41 }
  0xac   : > { %725 = vmatmul.mubr.f32.gmra.mxu0 %v578_v47  ;;  %886 = vmatmul.mubr.f32.gmra.mxu1 %v578_v47 }
  0xad   : > { %730 = vmatprep.mubr.f32.mxu0 %v2025_v2  ;;  %891 = vmatprep.mubr.f32.mxu1 %v2025_v2 }
  0xae   : > { %1642 = vmatprep.subr.mxu0 %v526_v48  ;;  %1722 = vmatprep.subr.mxu1 %v558_v49 }
  0xaf   : > { %1643 = vmatpush3.msra.mxu0 %v510_v50  ;;  %1723 = vmatpush3.msra.mxu1 %v542_v51 }
  0xb0   : > { %731 = vmatmul.mubr.f32.gmra.mxu0 %v579_v52  ;;  %892 = vmatmul.mubr.f32.gmra.mxu1 %v579_v52 }
  0xb1   : > { %736 = vmatprep.mubr.f32.mxu0 %v2025_v2  ;;  %897 = vmatprep.mubr.f32.mxu1 %v2025_v2 }
  0xb2   : > { %1644 = vmatprep.subr.mxu0 %v525_v53  ;;  %1724 = vmatprep.subr.mxu1 %v557_v54 }
  0xb3   : > { %1645 = vmatpush3.msra.mxu0 %v509_v55  ;;  %1725 = vmatpush3.msra.mxu1 %v541_v56 }
  0xb4   : > { %737 = vmatmul.mubr.f32.gmra.mxu0 %v580_v57  ;;  %898 = vmatmul.mubr.f32.gmra.mxu1 %v580_v57 }
  0xb5   : > { %742 = vmatprep.mubr.f32.mxu0 %v2025_v2  ;;  %903 = vmatprep.mubr.f32.mxu1 %v2025_v2 }
  0xb6   : > { %1646 = vmatprep.subr.mxu0 %v524_v58  ;;  %1726 = vmatprep.subr.mxu1 %v556_v59 }
  0xb7   : > { %1647 = vmatpush3.msra.mxu0 %v508_v60  ;;  %1727 = vmatpush3.msra.mxu1 %v540_v61 }
  0xb8   : > { %743 = vmatmul.mubr.f32.gmra.mxu0 %v581_v62  ;;  %904 = vmatmul.mubr.f32.gmra.mxu1 %v581_v62 }
  0xb9   : > { %748 = vmatprep.mubr.f32.mxu0 %v2025_v2  ;;  %909 = vmatprep.mubr.f32.mxu1 %v2025_v2 }
  0xba   : > { %1648 = vmatprep.subr.mxu0 %v523_v63  ;;  %1728 = vmatprep.subr.mxu1 %v555_v0 }
  0xbb   : > { %1649 = vmatpush3.msra.mxu0 %v507_v1  ;;  %1729 = vmatpush3.msra.mxu1 %v539_v3 }
  0xbc   : > { %749 = vmatmul.mubr.f32.gmra.mxu0 %v582_v4  ;;  %910 = vmatmul.mubr.f32.gmra.mxu1 %v582_v4 }
  0xbd   : > { %754 = vmatprep.mubr.f32.mxu0 %v2025_v2  ;;  %915 = vmatprep.mubr.f32.mxu1 %v2025_v2 }
  0xbe   : > { %1650 = vmatprep.subr.mxu0 %v522_v5  ;;  %1730 = vmatprep.subr.mxu1 %v554_v6 }
  0xbf   : > { %1651 = vmatpush3.msra.mxu0 %v506_v7  ;;  %1731 = vmatpush3.msra.mxu1 %v538_v8 }
  0xc0   : > { %755 = vmatmul.mubr.f32.gmra.mxu0 %v583_v9  ;;  %916 = vmatmul.mubr.f32.gmra.mxu1 %v583_v9 }
  0xc1   : > { %760 = vmatprep.mubr.f32.mxu0 %v2025_v2  ;;  %921 = vmatprep.mubr.f32.mxu1 %v2025_v2  ;;  %v552_v2 = vld [vmem:[%s2176_s28 + $0x180] sm:$0xff] }
  0xc2   : > { %1652 = vmatprep.subr.mxu0 %v521_v10  ;;  %1732 = vmatprep.subr.mxu1 %v553_v13 }
  0xc3   : > { %1653 = vmatpush3.msra.mxu0 %v505_v12  ;;  %1733 = vmatpush3.msra.mxu1 %v537_v14 }
  0xc4   : > { %761 = vmatmul.mubr.f32.gmra.mxu0 %v584_v11  ;;  %922 = vmatmul.mubr.f32.gmra.mxu1 %v584_v11 }
  0xc5   : > { %1654 = vmatprep.subr.mxu0 %v520_v15  ;;  %1734 = vmatprep.subr.mxu1 %v552_v2 }
  0xc6   : > { %1655 = vmatpush3.msra.mxu0 %v504_v16  ;;  %1735 = vmatpush3.msra.mxu1 %v536_v17 }
  0xc7   : > { %1861 = vset.pattern.permute.xlu0 %v2026_v20  ;;  %1862 = vset.pattern.permute.xlu1 %v2026_v20 }
  0xc8   : > { %1322 = vperm.xlu0 %1861, %v1288_v18   ;;  %1332 = vperm.xlu1 %1862, %v1290_v19  }
  0xcc   : > { %1327 = vperm.xlu0 %1861, %v1289_v21   ;;  %1337 = vperm.xlu1 %1862, %v1291_v22  }
  0xd0   : > { %1347 = vperm.xlu1 %1862, %v1293_v23   ;;  %1342 = vperm.xlu0 %1861, %v1292_v24  }
  0xd4   : > { %1357 = vperm.xlu1 %1862, %v1295_v25   ;;  %1352 = vperm.xlu0 %1861, %v1294_v26  }
  0xd8   : > { %1367 = vperm.xlu1 %1862, %v1297_v27   ;;  %1362 = vperm.xlu0 %1861, %v1296_v28  }
  0xdc   : > { %1377 = vperm.xlu1 %1862, %v1299_v29   ;;  %1372 = vperm.xlu0 %1861, %v1298_v30  }
  0xe0   : > { %1387 = vperm.xlu1 %1862, %v1301_v31   ;;  %1382 = vperm.xlu0 %1861, %v1300_v32  }
  0xe4   : > { %1397 = vperm.xlu1 %1862, %v1303_v33   ;;  %1392 = vperm.xlu0 %1861, %v1302_v34  }
 0x148   : > { %v672_v46 = vpop.f32.mrf.mxu0  ;;  %v833_v47 = vpop.f32.mrf.mxu1 }
 0x149   : > { %v834_v48 = vadd.f32 %v833_v47, %v2429_v42  ;;  %v673_v49 = vadd.f32 %v672_v46, %v2431_v43 }
 0x14a   : > { %v674_v50 = vpop.f32.mrf.mxu0  ;;  %v835_v51 = vpop.f32.mrf.mxu1 }
 0x14b   : > { %v675_v52 = vadd.f32 %v674_v50, %v2433_v44  ;;  %v836_v53 = vadd.f32 %v835_v51, %v2435_v45  ;;  %v930_v54 = vmax.f32 %v834_v48, 0.0  ;;  %v928_v60 = vmax.f32 %v673_v49, 0.0 }
 0x14c   : > { %v678_v55 = vpop.f32.mrf.mxu0  ;;  %v839_v56 = vpop.f32.mrf.mxu1 }
 0x14d   : > { %v929_v57 = vmax.f32 %v675_v52, 0.0  ;;  %v931_v58 = vmax.f32 %v836_v53, 0.0  ;;  %v840_v59 = vadd.f32 %v839_v56, %v2429_v42  ;;  %v679_v61 = vadd.f32 %v678_v55, %v2431_v43 }
 0x14e   : > { %v680_v62 = vpop.f32.mrf.mxu0  ;;  %v841_v63 = vpop.f32.mrf.mxu1 }
 0x14f   : > { %v681_v0 = vadd.f32 %v680_v62, %v2433_v44  ;;  %v842_v1 = vadd.f32 %v841_v63, %v2435_v45  ;;  %1062 = vmatprep.mubr.f32.mxu0 %v929_v57  ;;  %1207 = vmatprep.mubr.f32.mxu1 %v931_v58  ;;  %v934_v3 = vmax.f32 %v840_v59, 0.0  ;;  %v932_v9 = vmax.f32 %v679_v61, 0.0 }
 0x150   : > { %v684_v4 = vpop.f32.mrf.mxu0  ;;  %v845_v5 = vpop.f32.mrf.mxu1  ;;  %1063 = vmatmul.mubr.f32.vlgmr.msra.gmra.mxu0 %v928_v60  ;;  %1208 = vmatmul.mubr.f32.vlgmr.msra.gmra.mxu1 %v930_v54 }
 0x151   : > { %v933_v6 = vmax.f32 %v681_v0, 0.0  ;;  %v935_v7 = vmax.f32 %v842_v1, 0.0  ;;  %v846_v8 = vadd.f32 %v845_v5, %v2429_v42  ;;  %v685_v10 = vadd.f32 %v684_v4, %v2431_v43 }
 0x152   : > { %v686_v11 = vpop.f32.mrf.mxu0  ;;  %v847_v12 = vpop.f32.mrf.mxu1 }
 0x153   : > { %v687_v13 = vadd.f32 %v686_v11, %v2433_v44  ;;  %v848_v14 = vadd.f32 %v847_v12, %v2435_v45  ;;  %1067 = vmatprep.mubr.f32.mxu0 %v933_v6  ;;  %1212 = vmatprep.mubr.f32.mxu1 %v935_v7  ;;  %v938_v15 = vmax.f32 %v846_v8, 0.0  ;;  %v936_v20 = vmax.f32 %v685_v10, 0.0 }
 0x154   : > { %v690_v2 = vpop.f32.mrf.mxu0  ;;  %v851_v16 = vpop.f32.mrf.mxu1  ;;  %1068 = vmatmul.mubr.f32.gmra.mxu0 %v932_v9  ;;  %1213 = vmatmul.mubr.f32.gmra.mxu1 %v934_v3 }
 0x155   : > { %v937_v17 = vmax.f32 %v687_v13, 0.0  ;;  %v939_v18 = vmax.f32 %v848_v14, 0.0  ;;  %v852_v19 = vadd.f32 %v851_v16, %v2429_v42  ;;  %v691_v21 = vadd.f32 %v690_v2, %v2431_v43 }
 0x156   : > { %v692_v22 = vpop.f32.mrf.mxu0  ;;  %v853_v23 = vpop.f32.mrf.mxu1 }
 0x157   : > { %v693_v24 = vadd.f32 %v692_v22, %v2433_v44  ;;  %v854_v25 = vadd.f32 %v853_v23, %v2435_v45  ;;  %1072 = vmatprep.mubr.f32.mxu0 %v937_v17  ;;  %1217 = vmatprep.mubr.f32.mxu1 %v939_v18  ;;  %v942_v26 = vmax.f32 %v852_v19, 0.0  ;;  %v940_v32 = vmax.f32 %v691_v21, 0.0 }
 0x158   : > { %v696_v27 = vpop.f32.mrf.mxu0  ;;  %v857_v28 = vpop.f32.mrf.mxu1  ;;  %1073 = vmatmul.mubr.f32.gmra.mxu0 %v936_v20  ;;  %1218 = vmatmul.mubr.f32.gmra.mxu1 %v938_v15 }
 0x159   : > { %v941_v29 = vmax.f32 %v693_v24, 0.0  ;;  %v943_v30 = vmax.f32 %v854_v25, 0.0  ;;  %v858_v31 = vadd.f32 %v857_v28, %v2429_v42  ;;  %v697_v33 = vadd.f32 %v696_v27, %v2431_v43 }
 0x15a   : > { %v698_v34 = vpop.f32.mrf.mxu0  ;;  %v859_v35 = vpop.f32.mrf.mxu1 }
 0x15b   : > { %v699_v36 = vadd.f32 %v698_v34, %v2433_v44  ;;  %v860_v37 = vadd.f32 %v859_v35, %v2435_v45  ;;  %1077 = vmatprep.mubr.f32.mxu0 %v941_v29  ;;  %1222 = vmatprep.mubr.f32.mxu1 %v943_v30  ;;  %v946_v38 = vmax.f32 %v858_v31, 0.0  ;;  %v944_v48 = vmax.f32 %v697_v33, 0.0 }
 0x15c   : > { %v702_v39 = vpop.f32.mrf.mxu0  ;;  %v863_v40 = vpop.f32.mrf.mxu1  ;;  %1078 = vmatmul.mubr.f32.gmra.mxu0 %v940_v32  ;;  %1223 = vmatmul.mubr.f32.gmra.mxu1 %v942_v26 }
 0x15d   : > { %v945_v41 = vmax.f32 %v699_v36, 0.0  ;;  %v947_v46 = vmax.f32 %v860_v37, 0.0  ;;  %v864_v47 = vadd.f32 %v863_v40, %v2429_v42  ;;  %v703_v49 = vadd.f32 %v702_v39, %v2431_v43 }
 0x15e   : > { %v704_v50 = vpop.f32.mrf.mxu0  ;;  %v865_v51 = vpop.f32.mrf.mxu1 }
 0x15f   : > { %v705_v52 = vadd.f32 %v704_v50, %v2433_v44  ;;  %v866_v53 = vadd.f32 %v865_v51, %v2435_v45  ;;  %1082 = vmatprep.mubr.f32.mxu0 %v945_v41  ;;  %1227 = vmatprep.mubr.f32.mxu1 %v947_v46  ;;  %v950_v54 = vmax.f32 %v864_v47, 0.0  ;;  %v948_v60 = vmax.f32 %v703_v49, 0.0 }
 0x160   : > { %v708_v55 = vpop.f32.mrf.mxu0  ;;  %v869_v56 = vpop.f32.mrf.mxu1  ;;  %1083 = vmatmul.mubr.f32.gmra.mxu0 %v944_v48  ;;  %1228 = vmatmul.mubr.f32.gmra.mxu1 %v946_v38 }
 0x161   : > { %v949_v57 = vmax.f32 %v705_v52, 0.0  ;;  %v951_v58 = vmax.f32 %v866_v53, 0.0  ;;  %v870_v59 = vadd.f32 %v869_v56, %v2429_v42  ;;  %v709_v61 = vadd.f32 %v708_v55, %v2431_v43 }
 0x162   : > { %v710_v62 = vpop.f32.mrf.mxu0  ;;  %v871_v63 = vpop.f32.mrf.mxu1 }
 0x163   : > { %v711_v0 = vadd.f32 %v710_v62, %v2433_v44  ;;  %v872_v1 = vadd.f32 %v871_v63, %v2435_v45  ;;  %1087 = vmatprep.mubr.f32.mxu0 %v949_v57  ;;  %1232 = vmatprep.mubr.f32.mxu1 %v951_v58  ;;  %v954_v3 = vmax.f32 %v870_v59, 0.0  ;;  %v952_v9 = vmax.f32 %v709_v61, 0.0 }
 0x164   : > { %v714_v4 = vpop.f32.mrf.mxu0  ;;  %v875_v5 = vpop.f32.mrf.mxu1  ;;  %1088 = vmatmul.mubr.f32.gmra.mxu0 %v948_v60  ;;  %1233 = vmatmul.mubr.f32.gmra.mxu1 %v950_v54 }
 0x165   : > { %v953_v6 = vmax.f32 %v711_v0, 0.0  ;;  %v955_v7 = vmax.f32 %v872_v1, 0.0  ;;  %v876_v8 = vadd.f32 %v875_v5, %v2429_v42  ;;  %v715_v10 = vadd.f32 %v714_v4, %v2431_v43 }
 0x166   : > { %v716_v11 = vpop.f32.mrf.mxu0  ;;  %v877_v12 = vpop.f32.mrf.mxu1 }
 0x167   : > { %v717_v13 = vadd.f32 %v716_v11, %v2433_v44  ;;  %v878_v14 = vadd.f32 %v877_v12, %v2435_v45  ;;  %1092 = vmatprep.mubr.f32.mxu0 %v953_v6  ;;  %1237 = vmatprep.mubr.f32.mxu1 %v955_v7  ;;  %v958_v15 = vmax.f32 %v876_v8, 0.0  ;;  %v956_v20 = vmax.f32 %v715_v10, 0.0 }
 0x168   : > { %v720_v2 = vpop.f32.mrf.mxu0  ;;  %v881_v16 = vpop.f32.mrf.mxu1  ;;  %1093 = vmatmul.mubr.f32.gmra.mxu0 %v952_v9  ;;  %1238 = vmatmul.mubr.f32.gmra.mxu1 %v954_v3 }
 0x169   : > { %v957_v17 = vmax.f32 %v717_v13, 0.0  ;;  %v959_v18 = vmax.f32 %v878_v14, 0.0  ;;  %v882_v19 = vadd.f32 %v881_v16, %v2429_v42  ;;  %v721_v21 = vadd.f32 %v720_v2, %v2431_v43 }
 0x16a   : > { %v722_v22 = vpop.f32.mrf.mxu0  ;;  %v883_v23 = vpop.f32.mrf.mxu1 }
 0x16b   : > { %v723_v24 = vadd.f32 %v722_v22, %v2433_v44  ;;  %v884_v25 = vadd.f32 %v883_v23, %v2435_v45  ;;  %1097 = vmatprep.mubr.f32.mxu0 %v957_v17  ;;  %1242 = vmatprep.mubr.f32.mxu1 %v959_v18  ;;  %v962_v26 = vmax.f32 %v882_v19, 0.0  ;;  %v960_v32 = vmax.f32 %v721_v21, 0.0 }
 0x16c   : > { %v726_v27 = vpop.f32.mrf.mxu0  ;;  %v887_v28 = vpop.f32.mrf.mxu1  ;;  %1098 = vmatmul.mubr.f32.gmra.mxu0 %v956_v20  ;;  %1243 = vmatmul.mubr.f32.gmra.mxu1 %v958_v15 }
 0x16d   : > { %v961_v29 = vmax.f32 %v723_v24, 0.0  ;;  %v963_v30 = vmax.f32 %v884_v25, 0.0  ;;  %v888_v31 = vadd.f32 %v887_v28, %v2429_v42  ;;  %v727_v33 = vadd.f32 %v726_v27, %v2431_v43 }
 0x16e   : > { %v728_v34 = vpop.f32.mrf.mxu0  ;;  %v889_v35 = vpop.f32.mrf.mxu1 }
 0x16f   : > { %v729_v36 = vadd.f32 %v728_v34, %v2433_v44  ;;  %v890_v37 = vadd.f32 %v889_v35, %v2435_v45  ;;  %1102 = vmatprep.mubr.f32.mxu0 %v961_v29  ;;  %1247 = vmatprep.mubr.f32.mxu1 %v963_v30  ;;  %v966_v38 = vmax.f32 %v888_v31, 0.0  ;;  %v964_v48 = vmax.f32 %v727_v33, 0.0 }
 0x170   : > { %v732_v39 = vpop.f32.mrf.mxu0  ;;  %v893_v40 = vpop.f32.mrf.mxu1  ;;  %1103 = vmatmul.mubr.f32.gmra.mxu0 %v960_v32  ;;  %1248 = vmatmul.mubr.f32.gmra.mxu1 %v962_v26 }
 0x171   : > { %v965_v41 = vmax.f32 %v729_v36, 0.0  ;;  %v967_v46 = vmax.f32 %v890_v37, 0.0  ;;  %v894_v47 = vadd.f32 %v893_v40, %v2429_v42  ;;  %v733_v49 = vadd.f32 %v732_v39, %v2431_v43 }
 0x172   : > { %v734_v50 = vpop.f32.mrf.mxu0  ;;  %v895_v51 = vpop.f32.mrf.mxu1 }
 0x173   : > { %v735_v52 = vadd.f32 %v734_v50, %v2433_v44  ;;  %v896_v53 = vadd.f32 %v895_v51, %v2435_v45  ;;  %1107 = vmatprep.mubr.f32.mxu0 %v965_v41  ;;  %1252 = vmatprep.mubr.f32.mxu1 %v967_v46  ;;  %v970_v54 = vmax.f32 %v894_v47, 0.0  ;;  %v968_v60 = vmax.f32 %v733_v49, 0.0 }
 0x174   : > { %v738_v55 = vpop.f32.mrf.mxu0  ;;  %v899_v56 = vpop.f32.mrf.mxu1  ;;  %1108 = vmatmul.mubr.f32.gmra.mxu0 %v964_v48  ;;  %1253 = vmatmul.mubr.f32.gmra.mxu1 %v966_v38 }
 0x175   : > { %v969_v57 = vmax.f32 %v735_v52, 0.0  ;;  %v971_v58 = vmax.f32 %v896_v53, 0.0  ;;  %v900_v59 = vadd.f32 %v899_v56, %v2429_v42  ;;  %v739_v61 = vadd.f32 %v738_v55, %v2431_v43 }
 0x176   : > { %v740_v62 = vpop.f32.mrf.mxu0  ;;  %v901_v63 = vpop.f32.mrf.mxu1 }
 0x177   : > { %v741_v0 = vadd.f32 %v740_v62, %v2433_v44  ;;  %v902_v1 = vadd.f32 %v901_v63, %v2435_v45  ;;  %1112 = vmatprep.mubr.f32.mxu0 %v969_v57  ;;  %1257 = vmatprep.mubr.f32.mxu1 %v971_v58  ;;  %v974_v3 = vmax.f32 %v900_v59, 0.0  ;;  %v972_v9 = vmax.f32 %v739_v61, 0.0 }
 0x178   : > { %v744_v4 = vpop.f32.mrf.mxu0  ;;  %v905_v5 = vpop.f32.mrf.mxu1  ;;  %1113 = vmatmul.mubr.f32.gmra.mxu0 %v968_v60  ;;  %1258 = vmatmul.mubr.f32.gmra.mxu1 %v970_v54 }
 0x179   : > { %v973_v6 = vmax.f32 %v741_v0, 0.0  ;;  %v975_v7 = vmax.f32 %v902_v1, 0.0  ;;  %v906_v8 = vadd.f32 %v905_v5, %v2429_v42  ;;  %v745_v10 = vadd.f32 %v744_v4, %v2431_v43  ;;  %v1323_v60 = vpop.permute.xlu0 %1322 }
 0x17a   : > { %v746_v11 = vpop.f32.mrf.mxu0  ;;  %v907_v12 = vpop.f32.mrf.mxu1 }
 0x17b   : > { %v747_v13 = vadd.f32 %v746_v11, %v2433_v44  ;;  %v908_v14 = vadd.f32 %v907_v12, %v2435_v45  ;;  %1117 = vmatprep.mubr.f32.mxu0 %v973_v6  ;;  %1262 = vmatprep.mubr.f32.mxu1 %v975_v7  ;;  %v978_v15 = vmax.f32 %v906_v8, 0.0  ;;  %v976_v20 = vmax.f32 %v745_v10, 0.0  ;;  %v1304_v6 = vld [vmem:[#allocation9] sm:$0xff] }
 0x17c   : > { %v750_v2 = vpop.f32.mrf.mxu0  ;;  %v911_v16 = vpop.f32.mrf.mxu1  ;;  %1118 = vmatmul.mubr.f32.gmra.mxu0 %v972_v9  ;;  %1263 = vmatmul.mubr.f32.gmra.mxu1 %v974_v3 }
 0x17d   : > { %v977_v17 = vmax.f32 %v747_v13, 0.0  ;;  %v979_v18 = vmax.f32 %v908_v14, 0.0  ;;  %v912_v19 = vadd.f32 %v911_v16, %v2429_v42  ;;  %v751_v21 = vadd.f32 %v750_v2, %v2431_v43  ;;  %v1328_v12 = vpop.permute.xlu0 %1327 }
 0x17e   : > { %v752_v22 = vpop.f32.mrf.mxu0  ;;  %v913_v23 = vpop.f32.mrf.mxu1 }
 0x17f   : > { %v753_v24 = vadd.f32 %v752_v22, %v2433_v44  ;;  %v914_v25 = vadd.f32 %v913_v23, %v2435_v45  ;;  %1122 = vmatprep.mubr.f32.mxu0 %v977_v17  ;;  %1267 = vmatprep.mubr.f32.mxu1 %v979_v18  ;;  %v982_v26 = vmax.f32 %v912_v19, 0.0  ;;  %v980_v32 = vmax.f32 %v751_v21, 0.0  ;;  %v1305_v17 = vld [vmem:[#allocation9 + $0x8] sm:$0xff]  ;;  %v1333_v22 = vpop.permute.xlu1 %1332 }
 0x180   : > { %v756_v27 = vpop.f32.mrf.mxu0  ;;  %v917_v28 = vpop.f32.mrf.mxu1  ;;  %1123 = vmatmul.mubr.f32.gmra.mxu0 %v976_v20  ;;  %1268 = vmatmul.mubr.f32.gmra.mxu1 %v978_v15 }
 0x181   : > { %v981_v29 = vmax.f32 %v753_v24, 0.0  ;;  %v983_v30 = vmax.f32 %v914_v25, 0.0  ;;  %v918_v31 = vadd.f32 %v917_v28, %v2429_v42  ;;  %v757_v33 = vadd.f32 %v756_v27, %v2431_v43 }
 0x182   : > { %v758_v34 = vpop.f32.mrf.mxu0  ;;  %v919_v35 = vpop.f32.mrf.mxu1 }
 0x183   : > { %v759_v36 = vadd.f32 %v758_v34, %v2433_v44  ;;  %v920_v37 = vadd.f32 %v919_v35, %v2435_v45  ;;  %1127 = vmatprep.mubr.f32.mxu0 %v981_v29  ;;  %1272 = vmatprep.mubr.f32.mxu1 %v983_v30  ;;  %v986_v38 = vmax.f32 %v918_v31, 0.0  ;;  %v984_v48 = vmax.f32 %v757_v33, 0.0  ;;  %v1306_v29 = vld [vmem:[#allocation9 + $0x10] sm:$0xff] }
 0x184   : > { %v762_v39 = vpop.f32.mrf.mxu0  ;;  %v923_v40 = vpop.f32.mrf.mxu1  ;;  %1128 = vmatmul.mubr.f32.gmra.mxu0 %v980_v32  ;;  %1273 = vmatmul.mubr.f32.gmra.mxu1 %v982_v26 }
 0x185   : > { %v985_v41 = vmax.f32 %v759_v36, 0.0  ;;  %v987_v46 = vmax.f32 %v920_v37, 0.0  ;;  %v924_v47 = vadd.f32 %v923_v40, %v2429_v42  ;;  %v763_v49 = vadd.f32 %v762_v39, %v2431_v43 }
 0x186   : > { %v764_v50 = vpop.f32.mrf.mxu0  ;;  %v925_v51 = vpop.f32.mrf.mxu1 }
 0x187   : > { %v765_v52 = vadd.f32 %v764_v50, %v2433_v44  ;;  %v926_v53 = vadd.f32 %v925_v51, %v2435_v45  ;;  %1132 = vmatprep.mubr.f32.mxu0 %v985_v41  ;;  %1277 = vmatprep.mubr.f32.mxu1 %v987_v46  ;;  %v990_v54 = vmax.f32 %v924_v47, 0.0  ;;  %v988_v57 = vmax.f32 %v763_v49, 0.0  ;;  %v2506_v44 = vld [vmem:[%s410_s20] ss:$0 sm:$0xff]  ;;  %v1307_v41 = vld [vmem:[#allocation9 + $0x18] sm:$0xff] }
 0x188   : > { %1133 = vmatmul.mubr.f32.gmra.mxu0 %v984_v48  ;;  %1278 = vmatmul.mubr.f32.gmra.mxu1 %v986_v38  ;;  %v1338_v38 = vpop.permute.xlu1 %1337 }
 0x189   : > { %v989_v55 = vmax.f32 %v765_v52, 0.0  ;;  %v991_v56 = vmax.f32 %v926_v53, 0.0 }
 0x18b   : > { %1137 = vmatprep.mubr.f32.mxu0 %v989_v55  ;;  %1282 = vmatprep.mubr.f32.mxu1 %v991_v56 }
 0x18c   : > { %1138 = vmatmul.mubr.f32.gmra.mxu0 %v988_v57  ;;  %1283 = vmatmul.mubr.f32.gmra.mxu1 %v990_v54  ;;  %v1343_v54 = vpop.permute.xlu0 %1342  ;;  %v1308_v57 = vld [vmem:[#allocation9 + $0x20] sm:$0xff] }
 0x210   : > { %v1656_v42 = vpop.f32.mrf.mxu0  ;;  %v1736_v43 = vpop.f32.mrf.mxu1 }
 0x212   : > { %v1657_v45 = vpop.f32.mrf.mxu0  ;;  %v1737_v58 = vpop.f32.mrf.mxu1 }
 0x213   : > { %v1658_v59 = vadd.f32 %v1657_v45, %v1656_v42  ;;  %v1738_v0 = vadd.f32 %v1737_v58, %v1736_v43 }
 0x214   : > { %v1659_v61 = vpop.f32.mrf.mxu0  ;;  %v1739_v62 = vpop.f32.mrf.mxu1 }
 0x215   : > { %v1065_v63 = vadd.f32 %v1658_v59, %v2506_v44 }
 0x216   : > { %v1660_v1 = vpop.f32.mrf.mxu0  ;;  %v1740_v3 = vpop.f32.mrf.mxu1 }
 0x217   : > { %v1661_v4 = vadd.f32 %v1660_v1, %v1659_v61  ;;  %v1210_v5 = vadd.f32 %v1738_v0, %v1065_v63  ;;  %v1741_v10 = vadd.f32 %v1740_v3, %v1739_v62  ;;  %v1348_v62 = vpop.permute.xlu1 %1347  ;;  %v1309_v3 = vld [vmem:[#allocation9 + $0x28] sm:$0xff] }
 0x218   : > { %v1662_v7 = vpop.f32.mrf.mxu0  ;;  %v1742_v8 = vpop.f32.mrf.mxu1 }
 0x219   : > { %v1070_v9 = vadd.f32 %v1661_v4, %v2506_v44  ;;  %v1400_v11 = vmul.f32 %v1323_v60, %v1210_v5 }
 0x21a   : > { %v1663_v13 = vpop.f32.mrf.mxu0  ;;  %v1743_v14 = vpop.f32.mrf.mxu1 }
 0x21b   : > { %v1416_v15 = vadd.f32 %v1400_v11, %v1304_v6  ;;  %v1664_v2 = vadd.f32 %v1663_v13, %v1662_v7  ;;  %v1215_v16 = vadd.f32 %v1741_v10, %v1070_v9  ;;  %v1744_v21 = vadd.f32 %v1743_v14, %v1742_v8 }
 0x21c   : > { %v1665_v18 = vpop.f32.mrf.mxu0  ;;  %v1745_v19 = vpop.f32.mrf.mxu1 }
 0x21d   : > { %1432 = vst [vmem:[#allocation9] sm:$0xff] %v1416_v15  ;;  %v1075_v20 = vadd.f32 %v1664_v2, %v2506_v44  ;;  %v1401_v23 = vmul.f32 %v1328_v12, %v1215_v16  ;;  %v1353_v12 = vpop.permute.xlu0 %1352  ;;  %v1310_v15 = vld [vmem:[#allocation9 + $0x30] sm:$0xff] }
 0x21e   : > { %v1666_v24 = vpop.f32.mrf.mxu0  ;;  %v1746_v25 = vpop.f32.mrf.mxu1 }
 0x21f   : > { %v1220_v26 = vadd.f32 %v1744_v21, %v1075_v20  ;;  %v1417_v27 = vadd.f32 %v1401_v23, %v1305_v17  ;;  %v1667_v28 = vadd.f32 %v1666_v24, %v1665_v18  ;;  %v1747_v34 = vadd.f32 %v1746_v25, %v1745_v19 }
 0x220   : > { %v1668_v30 = vpop.f32.mrf.mxu0  ;;  %v1748_v31 = vpop.f32.mrf.mxu1 }
 0x221   : > { %v1402_v32 = vmul.f32 %v1333_v22, %v1220_v26  ;;  %1433 = vst [vmem:[#allocation9 + $0x8] sm:$0xff] %v1417_v27  ;;  %v1080_v33 = vadd.f32 %v1667_v28, %v2506_v44  ;;  %v1358_v22 = vpop.permute.xlu1 %1357  ;;  %v1311_v26 = vld [vmem:[#allocation9 + $0x38] sm:$0xff] }
 0x222   : > { %v1669_v35 = vpop.f32.mrf.mxu0  ;;  %v1749_v36 = vpop.f32.mrf.mxu1 }
 0x223   : > { %v1418_v37 = vadd.f32 %v1402_v32, %v1306_v29  ;;  %v1225_v39 = vadd.f32 %v1747_v34, %v1080_v33  ;;  %v1670_v40 = vadd.f32 %v1669_v35, %v1668_v30  ;;  %v1750_v50 = vadd.f32 %v1749_v36, %v1748_v31  ;;  %v1363_v34 = vpop.permute.xlu0 %1362 }
 0x224   : > { %v1671_v46 = vpop.f32.mrf.mxu0  ;;  %v1751_v47 = vpop.f32.mrf.mxu1 }
 0x225   : > { %1434 = vst [vmem:[#allocation9 + $0x10] sm:$0xff] %v1418_v37  ;;  %v1403_v48 = vmul.f32 %v1338_v38, %v1225_v39  ;;  %v1085_v49 = vadd.f32 %v1670_v40, %v2506_v44  ;;  %v1312_v38 = vld [vmem:[#allocation9 + $0x40] sm:$0xff] }
 0x226   : > { %v1672_v51 = vpop.f32.mrf.mxu0  ;;  %v1752_v52 = vpop.f32.mrf.mxu1 }
 0x227   : > { %v1419_v53 = vadd.f32 %v1403_v48, %v1307_v41  ;;  %v1230_v55 = vadd.f32 %v1750_v50, %v1085_v49  ;;  %v1673_v56 = vadd.f32 %v1672_v51, %v1671_v46  ;;  %v1753_v59 = vadd.f32 %v1752_v52, %v1751_v47  ;;  %v1368_v50 = vpop.permute.xlu1 %1367 }
 0x228   : > { %v1674_v42 = vpop.f32.mrf.mxu0  ;;  %v1754_v43 = vpop.f32.mrf.mxu1 }
 0x229   : > { %1435 = vst [vmem:[#allocation9 + $0x18] sm:$0xff] %v1419_v53  ;;  %v1404_v45 = vmul.f32 %v1343_v54, %v1230_v55  ;;  %v1090_v58 = vadd.f32 %v1673_v56, %v2506_v44  ;;  %v1313_v54 = vld [vmem:[#allocation9 + $0x48] sm:$0xff] }
 0x22a   : > { %v1675_v60 = vpop.f32.mrf.mxu0  ;;  %v1755_v61 = vpop.f32.mrf.mxu1 }
 0x22b   : > { %v1420_v63 = vadd.f32 %v1404_v45, %v1308_v57  ;;  %v1235_v0 = vadd.f32 %v1753_v59, %v1090_v58  ;;  %v1676_v1 = vadd.f32 %v1675_v60, %v1674_v42  ;;  %v1756_v8 = vadd.f32 %v1755_v61, %v1754_v43  ;;  %v1373_v59 = vpop.permute.xlu0 %1372 }
 0x22c   : > { %v1677_v4 = vpop.f32.mrf.mxu0  ;;  %v1757_v5 = vpop.f32.mrf.mxu1 }
 0x22d   : > { %1436 = vst [vmem:[#allocation9 + $0x20] sm:$0xff] %v1420_v63  ;;  %v1405_v6 = vmul.f32 %v1348_v62, %v1235_v0  ;;  %v1095_v7 = vadd.f32 %v1676_v1, %v2506_v44  ;;  %v1314_v63 = vld [vmem:[#allocation9 + $0x50] sm:$0xff] }
 0x22e   : > { %v1678_v9 = vpop.f32.mrf.mxu0  ;;  %v1758_v10 = vpop.f32.mrf.mxu1 }
 0x22f   : > { %v1421_v11 = vadd.f32 %v1405_v6, %v1309_v3  ;;  %v1240_v13 = vadd.f32 %v1756_v8, %v1095_v7  ;;  %v1679_v14 = vadd.f32 %v1678_v9, %v1677_v4  ;;  %v1759_v19 = vadd.f32 %v1758_v10, %v1757_v5  ;;  %v1378_v8 = vpop.permute.xlu1 %1377 }
 0x230   : > { %v1680_v2 = vpop.f32.mrf.mxu0  ;;  %v1760_v16 = vpop.f32.mrf.mxu1 }
 0x231   : > { %1437 = vst [vmem:[#allocation9 + $0x28] sm:$0xff] %v1421_v11  ;;  %v1406_v17 = vmul.f32 %v1353_v12, %v1240_v13  ;;  %v1100_v18 = vadd.f32 %v1679_v14, %v2506_v44  ;;  %v1315_v12 = vld [vmem:[#allocation9 + $0x58] sm:$0xff] }
 0x232   : > { %v1681_v20 = vpop.f32.mrf.mxu0  ;;  %v1761_v21 = vpop.f32.mrf.mxu1 }
 0x233   : > { %v1422_v23 = vadd.f32 %v1406_v17, %v1310_v15  ;;  %v1245_v24 = vadd.f32 %v1759_v19, %v1100_v18  ;;  %v1682_v25 = vadd.f32 %v1681_v20, %v1680_v2  ;;  %v1762_v31 = vadd.f32 %v1761_v21, %v1760_v16  ;;  %v1383_v19 = vpop.permute.xlu0 %1382 }
 0x234   : > { %v1683_v27 = vpop.f32.mrf.mxu0  ;;  %v1763_v28 = vpop.f32.mrf.mxu1 }
 0x235   : > { %1438 = vst [vmem:[#allocation9 + $0x30] sm:$0xff] %v1422_v23  ;;  %v1407_v29 = vmul.f32 %v1358_v22, %v1245_v24  ;;  %v1105_v30 = vadd.f32 %v1682_v25, %v2506_v44  ;;  %v1316_v23 = vld [vmem:[#allocation9 + $0x60] sm:$0xff] }
 0x236   : > { %v1684_v32 = vpop.f32.mrf.mxu0  ;;  %v1764_v33 = vpop.f32.mrf.mxu1 }
 0x237   : > { %v1423_v35 = vadd.f32 %v1407_v29, %v1311_v26  ;;  %v1250_v36 = vadd.f32 %v1762_v31, %v1105_v30  ;;  %v1685_v37 = vadd.f32 %v1684_v32, %v1683_v27  ;;  %v1765_v47 = vadd.f32 %v1764_v33, %v1763_v28  ;;  %v1388_v31 = vpop.permute.xlu1 %1387 }
 0x238   : > { %v1686_v39 = vpop.f32.mrf.mxu0  ;;  %v1766_v40 = vpop.f32.mrf.mxu1 }
 0x239   : > { %1439 = vst [vmem:[#allocation9 + $0x38] sm:$0xff] %v1423_v35  ;;  %v1408_v41 = vmul.f32 %v1363_v34, %v1250_v36  ;;  %v1110_v46 = vadd.f32 %v1685_v37, %v2506_v44  ;;  %v1317_v35 = vld [vmem:[#allocation9 + $0x68] sm:$0xff] }
 0x23a   : > { %v1687_v48 = vpop.f32.mrf.mxu0  ;;  %v1767_v49 = vpop.f32.mrf.mxu1 }
 0x23b   : > { %v1424_v51 = vadd.f32 %v1408_v41, %v1312_v38  ;;  %v1255_v52 = vadd.f32 %v1765_v47, %v1110_v46  ;;  %v1688_v53 = vadd.f32 %v1687_v48, %v1686_v39  ;;  %v1768_v43 = vadd.f32 %v1767_v49, %v1766_v40 }
 0x23c   : > { %v1689_v55 = vpop.f32.mrf.mxu0  ;;  %v1769_v56 = vpop.f32.mrf.mxu1 }
 0x23d   : > { %1440 = vst [vmem:[#allocation9 + $0x40] sm:$0xff] %v1424_v51  ;;  %v1409_v57 = vmul.f32 %v1368_v50, %v1255_v52  ;;  %v1115_v42 = vadd.f32 %v1688_v53, %v2506_v44  ;;  %v1393_v50 = vpop.permute.xlu0 %1392  ;;  %v1318_v51 = vld [vmem:[#allocation9 + $0x70] sm:$0xff] }
 0x23e   : > { %v1690_v45 = vpop.f32.mrf.mxu0  ;;  %v1770_v58 = vpop.f32.mrf.mxu1 }
 0x23f   : > { %v1425_v60 = vadd.f32 %v1409_v57, %v1313_v54  ;;  %v1260_v61 = vadd.f32 %v1768_v43, %v1115_v42  ;;  %v1691_v62 = vadd.f32 %v1690_v45, %v1689_v55  ;;  %v1771_v5 = vadd.f32 %v1770_v58, %v1769_v56  ;;  %v1398_v57 = vpop.permute.xlu1 %1397  ;;  %v1319_v42 = vld [vmem:[#allocation9 + $0x78] sm:$0xff] }
 0x240   : > { %v1692_v0 = vpop.f32.mrf.mxu0  ;;  %v1772_v1 = vpop.f32.mrf.mxu1 }
 0x241   : > { %1441 = vst [vmem:[#allocation9 + $0x48] sm:$0xff] %v1425_v60  ;;  %v1410_v3 = vmul.f32 %v1373_v59, %v1260_v61  ;;  %v1120_v4 = vadd.f32 %v1691_v62, %v2506_v44 }
 0x242   : > { %v1693_v6 = vpop.f32.mrf.mxu0  ;;  %v1773_v7 = vpop.f32.mrf.mxu1 }
 0x243   : > { %v1426_v9 = vadd.f32 %v1410_v3, %v1314_v63  ;;  %v1265_v10 = vadd.f32 %v1771_v5, %v1120_v4  ;;  %v1694_v11 = vadd.f32 %v1693_v6, %v1692_v0  ;;  %v1774_v16 = vadd.f32 %v1773_v7, %v1772_v1 }
 0x244   : > { %v1695_v13 = vpop.f32.mrf.mxu0  ;;  %v1775_v14 = vpop.f32.mrf.mxu1 }
 0x245   : > { %1442 = vst [vmem:[#allocation9 + $0x50] sm:$0xff] %v1426_v9  ;;  %v1411_v15 = vmul.f32 %v1378_v8, %v1265_v10  ;;  %v1125_v2 = vadd.f32 %v1694_v11, %v2506_v44 }
 0x246   : > { %v1696_v17 = vpop.f32.mrf.mxu0  ;;  %v1776_v18 = vpop.f32.mrf.mxu1 }
 0x247   : > { %v1427_v20 = vadd.f32 %v1411_v15, %v1315_v12  ;;  %v1270_v21 = vadd.f32 %v1774_v16, %v1125_v2  ;;  %v1697_v22 = vadd.f32 %v1696_v17, %v1695_v13  ;;  %v1777_v28 = vadd.f32 %v1776_v18, %v1775_v14 }
 0x248   : > { %v1698_v24 = vpop.f32.mrf.mxu0  ;;  %v1778_v25 = vpop.f32.mrf.mxu1 }
 0x249   : > { %1443 = vst [vmem:[#allocation9 + $0x58] sm:$0xff] %v1427_v20  ;;  %v1412_v26 = vmul.f32 %v1383_v19, %v1270_v21  ;;  %v1130_v27 = vadd.f32 %v1697_v22, %v2506_v44 }
 0x24a   : > { %v1699_v29 = vpop.f32.mrf.mxu0  ;;  %v1779_v30 = vpop.f32.mrf.mxu1 }
 0x24b   : > { %v1428_v32 = vadd.f32 %v1412_v26, %v1316_v23  ;;  %v1275_v33 = vadd.f32 %v1777_v28, %v1130_v27  ;;  %v1700_v34 = vadd.f32 %v1699_v29, %v1698_v24  ;;  %v1780_v40 = vadd.f32 %v1779_v30, %v1778_v25 }
 0x24c   : > { %v1701_v36 = vpop.f32.mrf.mxu0  ;;  %v1781_v37 = vpop.f32.mrf.mxu1 }
 0x24d   : > { %1444 = vst [vmem:[#allocation9 + $0x60] sm:$0xff] %v1428_v32  ;;  %v1413_v38 = vmul.f32 %v1388_v31, %v1275_v33  ;;  %v1135_v39 = vadd.f32 %v1700_v34, %v2506_v44 }
 0x24e   : > { %v1702_v41 = vpop.f32.mrf.mxu0  ;;  %v1782_v46 = vpop.f32.mrf.mxu1 }
 0x24f   : > { %v1429_v47 = vadd.f32 %v1413_v38, %v1317_v35  ;;  %v1280_v48 = vadd.f32 %v1780_v40, %v1135_v39  ;;  %v1703_v49 = vadd.f32 %v1702_v41, %v1701_v36  ;;  %v1783_v54 = vadd.f32 %v1782_v46, %v1781_v37 }
 0x251   : > { %1445 = vst [vmem:[#allocation9 + $0x68] sm:$0xff] %v1429_v47  ;;  %v1414_v52 = vmul.f32 %v1393_v50, %v1280_v48  ;;  %v1140_v53 = vadd.f32 %v1703_v49, %v2506_v44 }
 0x253   : > { %v1430_v55 = vadd.f32 %v1414_v52, %v1318_v51  ;;  %v1285_v56 = vadd.f32 %v1783_v54, %v1140_v53 }
 0x255   : > { %1446 = vst [vmem:[#allocation9 + $0x70] sm:$0xff] %v1430_v55  ;;  %v1415_v43 = vmul.f32 %v1398_v57, %v1285_v56 }
 0x257   : > { %v1431_v45 = vadd.f32 %v1415_v43, %v1319_v42 }
 0x259   : > { %1447 = vst [vmem:[#allocation9 + $0x78] sm:$0xff] %v1431_v45 }
 0x25a PF: > { %s2574_s11 = sadd.s32 4294967295, %s2015_s10   ;;  %s2027_s20 = smov [#allocation9]  }
 0x25b   : > { %p2526_p8 = scmp.eq.s32.totalorder %s2574_s11, 3  ;;  %s1457_s3 = sshll.u32 %s2027_s20, 4  ;;  %s1458_s3 = int_to_ptr.vmem [resolvable:$true] %s1457_s3 }
 0x25c   : > { %s1931_s26 = scalar_lea.vmem %s1458_s3, 2048  ;;  %p1938_p13 = scmp.lt.s32.totalorder %s1458_s3, %s1458_s3 }
 0x25d   : > { %p1932_p9 = scmp.ne.s32.totalorder %s1458_s3, %s1931_s26  ;;  %p1939_p2 = scmp.lt.s32.totalorder %s1931_s26, %s1931_s26 }
 0x25f   : > { %p1933_p10 = pnand %p1932_p9, %p2526_p8  ;;  %p1940_p3 = por %p1939_p2, %p1938_p13 }
 0x261   : > { %p1934_p11 = pneg %p1933_p10 }
 0x263   : > { %p1941_p4 = pnand %p1940_p3, %p1934_p11 }
 0x265   : > { %1944 = shalt.err (!%p1941_p4)
}
 0x266   : > { %s2028_s22 = smov 128   ;;  %s2029_s29 = smov 8  }
 0x267   : > { %1789 = dma.vmem_to_hbm [thread:$0]  (%p2526_p8), %s1458_s3, 2048, %s2566_s7, [#allocation6], %s2028_s22, %s2028_s22, %s2029_s29  }
 0x268   : > { %1990 = dma.done.wait (%p2526_p8), [#allocation6], 2048  }
 0x269   : > { %1992 = vsyncadd (%p2526_p8), [#allocation6], 4294965248 }
 0x26a PF: > { %s30_s10 = sadd.s32 1, %s2015_s10   ;;  %s2576_s29 = smov %s1999_s0 }
 0x26b   : > { %p27_p5 = scmp.ge.s32.totalorder %s30_s10, 6   ;;  %s2577_s0 = smov %s2003_s30 }
 0x26c   : > { %s2578_s30 = smov %s2124_s17  ;;  %s2579_s8 = smov %s2011_s9 }
 0x26d   : > { %s2580_s9 = smov %s2582_s12  ;;  %29 = sbr.rel (!%p27_p5) target bundleno = 22 (0x16), region = 115 }
 0x272   :  { %1473 = vsyncpa [#allocation5], 1 }
 0x273   :  { %1475 = vsyncpa [#allocation5 + $0x1], 1 }
 0x274   :  { %1476 = vsyncpa [#allocation8], 1 }
 0x275   :  { %1478 = vsyncpa [#allocation8 + $0x1], 1 }
 0x276   :  { %1479 = vsyncpa [#allocation6], 1 }
 0x277   :  { %1481 = vsyncpa [#allocation6 + $0x1], 1 }

</bundles_post_ra>
